<compile_context>
chip_gen: v6e
topology: v6e:2x2x1
jax: 0.10.0
libtpu: 0.0.40
codegen_flags: <defaults>
</compile_context>

<pallas_src>
import functools

import jax
import jax.numpy as jnp
from jax.experimental import pallas as pl
from jax.experimental.pallas import tpu as pltpu


def _round_up(x, m):
    return ((x + m - 1) // m) * m


# ----------------------------------------------------------------------------
# Conv3d: stride 1, 'same' padding.
#   * tap-folded im2col: one (HR*WR, 9*Cin) x (9*Cin, Cout) matmul per depth tap
#   * kd is a reduction grid axis ("arbitrary") with a VMEM f32 accumulator,
#     so only ONE padded depth slice is VMEM-resident per grid step
#   * spatial dims padded to multiples of 8 (no per-row fallback path)
#   * tiny Cout (flow=3, outc=16) padded to 128 output lanes, sliced after
#   * optional multi-input (tuple xs): fuses the skip-connection concat into
#     the conv as extra matmuls (no HBM concat round trip)
# ----------------------------------------------------------------------------

def _conv3d_kernel(*args, n_in, K, H, W, HR, WR, cins, TCo):
    x_refs = args[:n_in]
    w_refs = args[n_in:2 * n_in]
    b_ref = args[2 * n_in]
    o_ref = args[2 * n_in + 1]
    acc_ref = args[2 * n_in + 2]
    kd = pl.program_id(3)

    @pl.when(kd == 0)
    def _():
        acc_ref[...] = jnp.zeros_like(acc_ref)

    acc = acc_ref[...]
    for x_ref, w_ref, ci in zip(x_refs, w_refs, cins):
        # x_ref: (1, 1, HR+2p, WR+2p, ci) -- one padded depth slice (slice d+kd)
        # fold all K*K in-plane taps into a single contraction dim (im2col)
        cols = []
        for kh in range(K):
            for kw in range(K):
                xs = x_ref[0, 0, pl.ds(kh, HR), pl.ds(kw, WR), :]   # (HR, WR, ci)
                cols.append(xs.reshape(HR * WR, ci))
        patch = cols[0] if len(cols) == 1 else jnp.concatenate(cols, axis=1)
        acc = acc + jnp.dot(patch, w_ref[0], preferred_element_type=jnp.float32)
    acc_ref[...] = acc

    @pl.when(kd == K - 1)
    def _():
        y = acc_ref[...] + b_ref[...]                    # (HR*WR, TCo)
        o_ref[0, 0] = y.reshape(HR, WR, TCo)[:H, :W, :]  # drop alignment pad


def conv3d(xs, w, b, *, k):
    """Conv3d, kernel k (1 or 3), stride 1, padding k//2.

    xs: one (N,D,H,W,Ci) array or a tuple of them (implicit channel concat,
        i.e. fused skip-connection concat).  w: (k^3, sum Ci, Cout), b: (1, Cout).
    """
    if not isinstance(xs, (tuple, list)):
        xs = (xs,)
    N, D, H, W, _ = xs[0].shape
    cins = tuple(int(x.shape[-1]) for x in xs)
    Cout = int(w.shape[-1])

    # lane-dense output for tiny channel counts (outc=16, flow=3): pad to 128
    cout_p = 128 if Cout < 32 else Cout
    if cout_p != Cout:
        w = jnp.pad(w, ((0, 0), (0, 0), (0, cout_p - Cout)))
        b = jnp.pad(b, ((0, 0), (0, cout_p - Cout)))

    p = k // 2
    HR, WR = _round_up(H, 8), _round_up(W, 8)       # spatial -> sublane multiples
    HPR, WPR = HR + 2 * p, WR + 2 * p

    xps = [jnp.pad(x, ((0, 0), (p, p), (p, HR - H + p), (p, WR - W + p), (0, 0)))
           for x in xs]

    # split weight rows per input, fold (kh,kw,ci) into one contraction dim
    w_parts, off = [], 0
    for ci in cins:
        w_parts.append(w[:, off:off + ci, :].reshape(k, k * k * ci, cout_p))
        off += ci

    tco = cout_p                 # all Cout <= 512 in this net: one Cout tile
    J = cout_p // tco

    kern = functools.partial(_conv3d_kernel, n_in=len(xs), K=k, H=H, W=W,
                             HR=HR, WR=WR, cins=cins, TCo=tco)

    x_specs = [pl.BlockSpec((1, 1, HPR, WPR, ci),
                            lambda n, d, j, kd: (n, d + kd, 0, 0, 0))
               for ci in cins]
    w_specs = [pl.BlockSpec((1, k * k * ci, tco),
                            lambda n, d, j, kd: (kd, 0, j))
               for ci in cins]
    b_spec = pl.BlockSpec((1, tco), lambda n, d, j, kd: (0, j))
    o_spec = pl.BlockSpec((1, 1, H, W, tco), lambda n, d, j, kd: (n, d, 0, 0, j))

    out = pl.pallas_call(
        kern,
        out_shape=jax.ShapeDtypeStruct((N, D, H, W, cout_p), jnp.float32),
        grid=(N, D, J, k),
        in_specs=x_specs + w_specs + [b_spec],
        out_specs=o_spec,
        scratch_shapes=[pltpu.VMEM((HR * WR, tco), jnp.float32)],
        compiler_params=pltpu.CompilerParams(
            dimension_semantics=("parallel", "parallel", "parallel", "arbitrary")),
    )(*xps, *w_parts, b)

    if cout_p != Cout:
        out = out[..., :Cout]
    return out


# ----------------------------------------------------------------------------
# BatchNorm (training mode, batch stats) + LeakyReLU: tiled two-pass
#   pass 1: per-tile sum / sum-of-squares accumulated into a (1, C) output
#   pass 2: y = x * scale + shift, LeakyReLU
# ----------------------------------------------------------------------------

def _bn_stats_kernel(x_ref, sum_ref, sq_ref):
    @pl.when(pl.program_id(0) == 0)
    def _():
        sum_ref[...] = jnp.zeros_like(sum_ref)
        sq_ref[...] = jnp.zeros_like(sq_ref)
    x = x_ref[...]
    sum_ref[...] += jnp.sum(x, axis=0, keepdims=True)
    sq_ref[...] += jnp.sum(x * x, axis=0, keepdims=True)


def _bn_apply_kernel(x_ref, scale_ref, shift_ref, o_ref, *, slope):
    y = x_ref[...] * scale_ref[...] + shift_ref[...]
    o_ref[...] = jnp.where(y >= 0, y, slope * y)


def _row_tile(M):
    for t in (512, 256, 128, 64, 32, 16, 8):
        if M % t == 0:
            return t
    return M


def batchnorm_lrelu(x, gamma, beta, eps=1e-5, slope=0.01):
    N, D, H, W, C = x.shape
    M = N * D * H * W
    x2 = x.reshape(M, C)
    TM = _row_tile(M)
    grid = (M // TM,)

    sums, sqs = pl.pallas_call(
        _bn_stats_kernel,
        out_shape=(jax.ShapeDtypeStruct((1, C), jnp.float32),
                   jax.ShapeDtypeStruct((1, C), jnp.float32)),
        grid=grid,
        in_specs=[pl.BlockSpec((TM, C), lambda i: (i, 0))],
        out_specs=(pl.BlockSpec((1, C), lambda i: (0, 0)),
                   pl.BlockSpec((1, C), lambda i: (0, 0))),
        compiler_params=pltpu.CompilerParams(dimension_semantics=("arbitrary",)),
    )(x2)

    mean = sums / M
    var = jnp.maximum(sqs / M - mean * mean, 0.0)       # biased variance
    scale = gamma * jax.lax.rsqrt(var + eps)
    shift = beta - mean * scale

    y = pl.pallas_call(
        functools.partial(_bn_apply_kernel, slope=slope),
        out_shape=jax.ShapeDtypeStruct((M, C), jnp.float32),
        grid=grid,
        in_specs=[pl.BlockSpec((TM, C), lambda i: (i, 0)),
                  pl.BlockSpec((1, C), lambda i: (0, 0)),
                  pl.BlockSpec((1, C), lambda i: (0, 0))],
        out_specs=pl.BlockSpec((TM, C), lambda i: (i, 0)),
        compiler_params=pltpu.CompilerParams(dimension_semantics=("parallel",)),
    )(x2, scale, shift)
    return y.reshape(N, D, H, W, C)


# ----------------------------------------------------------------------------
# MaxPool3d (1,2,2): single gridded kernel, no strided HBM copies in the wrapper
# ----------------------------------------------------------------------------

def _maxpool_kernel(x_ref, o_ref, *, Ho, Wo, C):
    x = x_ref[0, 0]                                   # (H, W, C)
    x4 = x.reshape(Ho, 2, x.shape[1], C)
    r = jnp.maximum(x4[:, 0], x4[:, 1])               # (Ho, W, C)
    m = r.reshape(Ho, Wo, 2 * C)                      # pair W into lanes
    o_ref[0, 0] = jnp.maximum(m[:, :, :C], m[:, :, C:])


def maxpool_1x2x2(x):
    N, D, H, W, C = x.shape
    assert H % 2 == 0 and W % 2 == 0, "MaxPool3d((1,2,2)) expects even H, W here"
    Ho, Wo = H // 2, W // 2
    return pl.pallas_call(
        functools.partial(_maxpool_kernel, Ho=Ho, Wo=Wo, C=C),
        out_shape=jax.ShapeDtypeStruct((N, D, Ho, Wo, C), jnp.float32),
        grid=(N, D),
        in_specs=[pl.BlockSpec((1, 1, H, W, C), lambda n, d: (n, d, 0, 0, 0))],
        out_specs=pl.BlockSpec((1, 1, Ho, Wo, C), lambda n, d: (n, d, 0, 0, 0)),
        compiler_params=pltpu.CompilerParams(
            dimension_semantics=("parallel", "parallel")),
    )(x)


# ----------------------------------------------------------------------------
# ConvTranspose3d kernel (1,2,2), stride (1,2,2):
#   one (H*W, Cin) x (Cin, 4*Cout) matmul, taps interleaved in-kernel
#   (no post-kernel HBM transpose of the upsampled tensor)
# ----------------------------------------------------------------------------

def _convT_kernel(x_ref, w_ref, b_ref, o_ref, *, H, W, Cin, Cout):
    x = x_ref[0, 0].reshape(H * W, Cin)
    y = jnp.dot(x, w_ref[...], preferred_element_type=jnp.float32) + b_ref[...]
    y = y.reshape(H, W, 4 * Cout)                     # cols: [i0j0|i0j1|i1j0|i1j1]
    z0 = y[:, :, :2 * Cout].reshape(H, 1, 2 * W, Cout)   # output rows 2h+0
    z1 = y[:, :, 2 * Cout:].reshape(H, 1, 2 * W, Cout)   # output rows 2h+1
    o_ref[0, 0] = jnp.concatenate([z0, z1], axis=1).reshape(2 * H, 2 * W, Cout)


def conv_transpose_1x2x2(x, w, b):
    """x: (N,D,H,W,Cin) -> (N,D,2H,2W,Cout); w: (4,Cin,Cout), taps ordered i*2+j."""
    N, D, H, W, Cin = x.shape
    Cout = int(w.shape[-1])
    wr = jnp.transpose(w, (1, 0, 2)).reshape(Cin, 4 * Cout)
    b4 = jnp.tile(b, (1, 4))
    return pl.pallas_call(
        functools.partial(_convT_kernel, H=H, W=W, Cin=Cin, Cout=Cout),
        out_shape=jax.ShapeDtypeStruct((N, D, 2 * H, 2 * W, Cout), jnp.float32),
        grid=(N, D),
        in_specs=[pl.BlockSpec((1, 1, H, W, Cin), lambda n, d: (n, d, 0, 0, 0)),
                  pl.BlockSpec((Cin, 4 * Cout), lambda n, d: (0, 0)),
                  pl.BlockSpec((1, 4 * Cout), lambda n, d: (0, 0))],
        out_specs=pl.BlockSpec((1, 1, 2 * H, 2 * W, Cout),
                               lambda n, d: (n, d, 0, 0, 0)),
        compiler_params=pltpu.CompilerParams(
            dimension_semantics=("parallel", "parallel")),
    )(x, wr, b4)


# ----------------------------------------------------------------------------
# SpatialTransformer (voxelmorph semantics: grid + flow, trilinear, zeros pad)
# TODO(synk): data-dependent trilinear gather kept in plain JAX (no clean
#             Pallas gather); transformer size = flow's spatial shape.
# ----------------------------------------------------------------------------

def spatial_transformer(src, flow):
    # src: (N, D, H, W, C); flow: (N, D, H, W, 3) with channels (dd, dh, dw)
    N, D, H, W, C = src.shape
    gd, gh, gw = jnp.meshgrid(jnp.arange(D, dtype=jnp.float32),
                              jnp.arange(H, dtype=jnp.float32),
                              jnp.arange(W, dtype=jnp.float32), indexing='ij')
    ld = gd[None] + flow[..., 0]
    lh = gh[None] + flow[..., 1]
    lw = gw[None] + flow[..., 2]
    d0 = jnp.floor(ld); h0 = jnp.floor(lh); w0 = jnp.floor(lw)
    fd = ld - d0; fh = lh - h0; fw = lw - w0
    nb = jnp.arange(N)[:, None, None, None]
    out = jnp.zeros_like(src)
    for dd, wd in ((d0, 1.0 - fd), (d0 + 1.0, fd)):
        for hh, wh in ((h0, 1.0 - fh), (h0 + 1.0, fh)):
            for ww, wwg in ((w0, 1.0 - fw), (w0 + 1.0, fw)):
                valid = ((dd >= 0) & (dd <= D - 1) & (hh >= 0) & (hh <= H - 1)
                         & (ww >= 0) & (ww <= W - 1))
                di = jnp.clip(dd, 0, D - 1).astype(jnp.int32)
                hi = jnp.clip(hh, 0, H - 1).astype(jnp.int32)
                wi = jnp.clip(ww, 0, W - 1).astype(jnp.int32)
                val = src[nb, di, hi, wi, :]
                wgt = (wd * wh * wwg) * valid.astype(jnp.float32)
                out = out + wgt[..., None] * val
    return out


# ----------------------------------------------------------------------------
# Model (Unet + VXm forward)
# ----------------------------------------------------------------------------

def conv_bn_lrelu(xs, p):
    return batchnorm_lrelu(conv3d(xs, p['w'], p['b'], k=3), p['gamma'], p['beta'])


def unet_forward(params, x):
    x1 = conv_bn_lrelu(x, params['inc'][0])
    x1 = conv_bn_lrelu(x1, params['inc'][1])

    t = maxpool_1x2x2(x1)
    t = conv_bn_lrelu(t, params['down1'][0])
    x2 = conv_bn_lrelu(t, params['down1'][1])

    t = maxpool_1x2x2(x2)
    t = conv_bn_lrelu(t, params['down2'][0])
    x3 = conv_bn_lrelu(t, params['down2'][1])

    t = maxpool_1x2x2(x3)
    t = conv_bn_lrelu(t, params['down3'][0])
    x4 = conv_bn_lrelu(t, params['down3'][1])

    u1 = conv_transpose_1x2x2(x4, params['uptconv1']['w'], params['uptconv1']['b'])
    t = conv_bn_lrelu((x3, u1), params['up1'][0])     # fused concat (crop=False)
    x5 = conv_bn_lrelu(t, params['up1'][1])

    u2 = conv_transpose_1x2x2(x5, params['uptconv2']['w'], params['uptconv2']['b'])
    t = conv_bn_lrelu((x2, u2), params['up2'][0])     # fused concat
    x6 = conv_bn_lrelu(t, params['up2'][1])

    u3 = conv_transpose_1x2x2(x6, params['uptconv3']['w'], params['uptconv3']['b'])
    t = conv_bn_lrelu((x1, u3), params['up3'][0])     # fused concat
    x7 = conv_bn_lrelu(t, params['up3'][1])

    x8 = conv3d(x7, params['outc']['w'], params['outc']['b'], k=1)
    return x8


def vxm_forward(params, source, target):
    x = jnp.concatenate([source, target], axis=-1)     # channel concat
    x = unet_forward(params['unet'], x)
    flow_field = conv3d(x, params['flow']['w'], params['flow']['b'], k=3)
    y_source = spatial_transformer(source, flow_field)
    return y_source, flow_field


# ----------------------------------------------------------------------------
# Deterministic parameter init (synthetic; matches module shapes)
# ----------------------------------------------------------------------------

def init_params(key, img_channels=1):
    cin = 2 * img_channels
    keys = iter(jax.random.split(key, 64))

    def conv_p(ci, co, k=3):
        std = (2.0 / (k * k * k * ci)) ** 0.5
        return {'w': jax.random.normal(next(keys), (k * k * k, ci, co), jnp.float32) * std,
                'b': jnp.zeros((1, co), jnp.float32)}

    def cbl_p(ci, co):
        p = conv_p(ci, co)
        p['gamma'] = jnp.ones((1, co), jnp.float32)
        p['beta'] = jnp.zeros((1, co), jnp.float32)
        return p

    def convT_p(ci, co):
        std = (1.0 / (4.0 * ci)) ** 0.5
        return {'w': jax.random.normal(next(keys), (4, ci, co), jnp.float32) * std,
                'b': jnp.zeros((1, co), jnp.float32)}

    unet = {
        'inc':   [cbl_p(cin, 32),  cbl_p(32, 64)],
        'down1': [cbl_p(64, 64),   cbl_p(64, 128)],
        'down2': [cbl_p(128, 128), cbl_p(128, 256)],
        'down3': [cbl_p(256, 256), cbl_p(256, 512)],
        'uptconv1': convT_p(512, 512),
        'up1':   [cbl_p(768, 256), cbl_p(256, 256)],
        'uptconv2': convT_p(256, 256),
        'up2':   [cbl_p(384, 128), cbl_p(128, 128)],
        'uptconv3': convT_p(128, 128),
        'up3':   [cbl_p(192, 64),  cbl_p(64, 64)],
        'outc':  conv_p(64, 16, k=1),
    }
    # flow conv: Normal(0, 1e-5) weights, zero bias (as in VXm.__init__)
    flow = {'w': jax.random.normal(next(keys), (27, 16, 3), jnp.float32) * 1e-5,
            'b': jnp.zeros((1, 3), jnp.float32)}
    return {'unet': unet, 'flow': flow}


if __name__ == "__main__":
    key = jax.random.PRNGKey(0)
    pkey, skey, tkey = jax.random.split(key, 3)
    params = init_params(pkey, img_channels=1)

    N, D, H, W, C = 1, 2, 16, 16, 1            # small shapes; NDHWC layout
    source = jax.random.normal(skey, (N, D, H, W, C), jnp.float32)
    target = jax.random.normal(tkey, (N, D, H, W, C), jnp.float32)

    y_source, flow_field = vxm_forward(params, source, target)
    jax.block_until_ready((y_source, flow_field))

    assert y_source.shape == (N, D, H, W, C)
    assert flow_field.shape == (N, D, H, W, 3)
    assert bool(jnp.all(jnp.isfinite(y_source))) and bool(jnp.all(jnp.isfinite(flow_field)))
    print("KERNEL_OK")
</pallas_src>

<mosaic_0001>
module attributes {stable_mosaic.version = 11 : i64} {
  func.func @_conv3d_kernel(%arg0: i32, %arg1: i32, %arg2: i32, %arg3: i32, %arg4: memref<1x1x18x18x2xf32, #tpu.memory_space<vmem>>, %arg5: memref<1x18x32xf32, #tpu.memory_space<vmem>>, %arg6: memref<1x32xf32, #tpu.memory_space<vmem>>, %arg7: memref<1x1x16x16x32xf32, #tpu.memory_space<vmem>>, %arg8: memref<256x32xf32, #tpu.memory_space<vmem>>) attributes {dimension_semantics = [#tpu.dimension_semantics<parallel>, #tpu.dimension_semantics<parallel>, #tpu.dimension_semantics<parallel>, #tpu.dimension_semantics<arbitrary>], iteration_bounds = array<i64: 1, 2, 1, 3>, scalar_prefetch = 0 : i64, scratch_operands = 1 : i64, tpu.core_type = #tpu.core_type<tc>, window_params = [{transform_indices = @transform_0, window_bounds = array<i64: 1, 1, 18, 18, 2>}, {transform_indices = @transform_1, window_bounds = array<i64: 1, 18, 32>}, {transform_indices = @transform_2, window_bounds = array<i64: 1, 32>}, {transform_indices = @transform_3, window_bounds = array<i64: 1, 1, 16, 16, 32>}]} {
    %c0_i32 = arith.constant 0 : i32
    %0 = arith.cmpi eq, %arg3, %c0_i32 : i32
    %1 = arith.extui %0 : i1 to i32
    %c0_i32_0 = arith.constant 0 : i32
    %2 = arith.cmpi ne, %1, %c0_i32_0 : i32
    scf.if %2 {
      %cst_51 = arith.constant 0.000000e+00 : f32
      %40 = vector.broadcast %cst_51 : f32 to vector<256x32xf32>
      %c0_52 = arith.constant 0 : index
      %c0_53 = arith.constant 0 : index
      %41 = vector.load %arg8[%c0_52, %c0_53] : memref<256x32xf32, #tpu.memory_space<vmem>>, vector<256x32xf32>
      tpu.vector_store %arg8[%c0_52, %c0_53], %40 {strides = array<i32>} : memref<256x32xf32, #tpu.memory_space<vmem>>, vector<256x32xf32>,
    } else {
    }
    %c0 = arith.constant 0 : index
    %c0_1 = arith.constant 0 : index
    %3 = vector.load %arg8[%c0, %c0_1] : memref<256x32xf32, #tpu.memory_space<vmem>>, vector<256x32xf32>
    %c0_2 = arith.constant 0 : index
    %c0_3 = arith.constant 0 : index
    %c0_4 = arith.constant 0 : index
    %c0_5 = arith.constant 0 : index
    %c0_6 = arith.constant 0 : index
    %4 = vector.load %arg4[%c0_2, %c0_3, %c0_4, %c0_5, %c0_6] : memref<1x1x18x18x2xf32, #tpu.memory_space<vmem>>, vector<1x1x16x16x2xf32>
    %5 = vector.shape_cast %4 : vector<1x1x16x16x2xf32> to vector<16x16x2xf32>
    %6 = vector.shape_cast %5 : vector<16x16x2xf32> to vector<256x2xf32>
    %c0_7 = arith.constant 0 : index
    %c0_8 = arith.constant 0 : index
    %c0_9 = arith.constant 0 : index
    %c1 = arith.constant 1 : index
    %c0_10 = arith.constant 0 : index
    %7 = vector.load %arg4[%c0_7, %c0_8, %c0_9, %c1, %c0_10] : memref<1x1x18x18x2xf32, #tpu.memory_space<vmem>>, vector<1x1x16x16x2xf32>
    %8 = vector.shape_cast %7 : vector<1x1x16x16x2xf32> to vector<16x16x2xf32>
    %9 = vector.shape_cast %8 : vector<16x16x2xf32> to vector<256x2xf32>
    %c0_11 = arith.constant 0 : index
    %c0_12 = arith.constant 0 : index
    %c0_13 = arith.constant 0 : index
    %c2 = arith.constant 2 : index
    %c0_14 = arith.constant 0 : index
    %10 = vector.load %arg4[%c0_11, %c0_12, %c0_13, %c2, %c0_14] : memref<1x1x18x18x2xf32, #tpu.memory_space<vmem>>, vector<1x1x16x16x2xf32>
    %11 = vector.shape_cast %10 : vector<1x1x16x16x2xf32> to vector<16x16x2xf32>
    %12 = vector.shape_cast %11 : vector<16x16x2xf32> to vector<256x2xf32>
    %c0_15 = arith.constant 0 : index
    %c0_16 = arith.constant 0 : index
    %c1_17 = arith.constant 1 : index
    %c0_18 = arith.constant 0 : index
    %c0_19 = arith.constant 0 : index
    %13 = vector.load %arg4[%c0_15, %c0_16, %c1_17, %c0_18, %c0_19] : memref<1x1x18x18x2xf32, #tpu.memory_space<vmem>>, vector<1x1x16x16x2xf32>
    %14 = vector.shape_cast %13 : vector<1x1x16x16x2xf32> to vector<16x16x2xf32>
    %15 = vector.shape_cast %14 : vector<16x16x2xf32> to vector<256x2xf32>
    %c0_20 = arith.constant 0 : index
    %c0_21 = arith.constant 0 : index
    %c1_22 = arith.constant 1 : index
    %c1_23 = arith.constant 1 : index
    %c0_24 = arith.constant 0 : index
    %16 = vector.load %arg4[%c0_20, %c0_21, %c1_22, %c1_23, %c0_24] : memref<1x1x18x18x2xf32, #tpu.memory_space<vmem>>, vector<1x1x16x16x2xf32>
    %17 = vector.shape_cast %16 : vector<1x1x16x16x2xf32> to vector<16x16x2xf32>
    %18 = vector.shape_cast %17 : vector<16x16x2xf32> to vector<256x2xf32>
    %c0_25 = arith.constant 0 : index
    %c0_26 = arith.constant 0 : index
    %c1_27 = arith.constant 1 : index
    %c2_28 = arith.constant 2 : index
    %c0_29 = arith.constant 0 : index
    %19 = vector.load %arg4[%c0_25, %c0_26, %c1_27, %c2_28, %c0_29] : memref<1x1x18x18x2xf32, #tpu.memory_space<vmem>>, vector<1x1x16x16x2xf32>
    %20 = vector.shape_cast %19 : vector<1x1x16x16x2xf32> to vector<16x16x2xf32>
    %21 = vector.shape_cast %20 : vector<16x16x2xf32> to vector<256x2xf32>
    %c0_30 = arith.constant 0 : index
    %c0_31 = arith.constant 0 : index
    %c2_32 = arith.constant 2 : index
    %c0_33 = arith.constant 0 : index
    %c0_34 = arith.constant 0 : index
    %22 = vector.load %arg4[%c0_30, %c0_31, %c2_32, %c0_33, %c0_34] : memref<1x1x18x18x2xf32, #tpu.memory_space<vmem>>, vector<1x1x16x16x2xf32>
    %23 = vector.shape_cast %22 : vector<1x1x16x16x2xf32> to vector<16x16x2xf32>
    %24 = vector.shape_cast %23 : vector<16x16x2xf32> to vector<256x2xf32>
    %c0_35 = arith.constant 0 : index
    %c0_36 = arith.constant 0 : index
    %c2_37 = arith.constant 2 : index
    %c1_38 = arith.constant 1 : index
    %c0_39 = arith.constant 0 : index
    %25 = vector.load %arg4[%c0_35, %c0_36, %c2_37, %c1_38, %c0_39] : memref<1x1x18x18x2xf32, #tpu.memory_space<vmem>>, vector<1x1x16x16x2xf32>
    %26 = vector.shape_cast %25 : vector<1x1x16x16x2xf32> to vector<16x16x2xf32>
    %27 = vector.shape_cast %26 : vector<16x16x2xf32> to vector<256x2xf32>
    %c0_40 = arith.constant 0 : index
    %c0_41 = arith.constant 0 : index
    %c2_42 = arith.constant 2 : index
    %c2_43 = arith.constant 2 : index
    %c0_44 = arith.constant 0 : index
    %28 = vector.load %arg4[%c0_40, %c0_41, %c2_42, %c2_43, %c0_44] : memref<1x1x18x18x2xf32, #tpu.memory_space<vmem>>, vector<1x1x16x16x2xf32>
    %29 = vector.shape_cast %28 : vector<1x1x16x16x2xf32> to vector<16x16x2xf32>
    %30 = vector.shape_cast %29 : vector<16x16x2xf32> to vector<256x2xf32>
    %31 = tpu.concatenate %6, %9, %12, %15, %18, %21, %24, %27, %30 in 1 : vector<256x2xf32>, vector<256x2xf32>, vector<256x2xf32>, vector<256x2xf32>, vector<256x2xf32>, vector<256x2xf32>, vector<256x2xf32>, vector<256x2xf32>, vector<256x2xf32> -> vector<256x18xf32>
    %c0_45 = arith.constant 0 : index
    %c0_46 = arith.constant 0 : index
    %c0_47 = arith.constant 0 : index
    %32 = vector.load %arg5[%c0_45, %c0_46, %c0_47] : memref<1x18x32xf32, #tpu.memory_space<vmem>>, vector<1x18x32xf32>
    %33 = vector.shape_cast %32 : vector<1x18x32xf32> to vector<18x32xf32>
    %cst = arith.constant dense<0.000000e+00> : vector<256x32xf32>
    %34 = tpu.matmul %31, %33, %cst {dimension_numbers = #tpu.dot_dimension_numbers<[1], [0], [0], [1], [0, 0, 1, 1], [], []>} : vector<256x18xf32>, vector<18x32xf32>, vector<256x32xf32> -> vector<256x32xf32>
    %35 = arith.addf %3, %34 : vector<256x32xf32>
    %c0_48 = arith.constant 0 : index
    %c0_49 = arith.constant 0 : index
    %36 = vector.load %arg8[%c0_48, %c0_49] : memref<256x32xf32, #tpu.memory_space<vmem>>, vector<256x32xf32>
    tpu.vector_store %arg8[%c0_48, %c0_49], %35 {strides = array<i32>} : memref<256x32xf32, #tpu.memory_space<vmem>>, vector<256x32xf32>,
    %c2_i32 = arith.constant 2 : i32
    %37 = arith.cmpi eq, %arg3, %c2_i32 : i32
    %38 = arith.extui %37 : i1 to i32
    %c0_i32_50 = arith.constant 0 : i32
    %39 = arith.cmpi ne, %38, %c0_i32_50 : i32
    scf.if %39 {
      %c0_51 = arith.constant 0 : index
      %c0_52 = arith.constant 0 : index
      %40 = vector.load %arg8[%c0_51, %c0_52] : memref<256x32xf32, #tpu.memory_space<vmem>>, vector<256x32xf32>
      %c0_53 = arith.constant 0 : index
      %c0_54 = arith.constant 0 : index
      %41 = vector.load %arg6[%c0_53, %c0_54] : memref<1x32xf32, #tpu.memory_space<vmem>>, vector<1x32xf32>
      %42 = vector.broadcast %41 : vector<1x32xf32> to vector<256x32xf32>
      %43 = arith.addf %40, %42 : vector<256x32xf32>
      %44 = vector.shape_cast %43 : vector<256x32xf32> to vector<16x16x32xf32>
      %c0_55 = arith.constant 0 : index
      %c0_56 = arith.constant 0 : index
      %c0_57 = arith.constant 0 : index
      %c0_58 = arith.constant 0 : index
      %c0_59 = arith.constant 0 : index
      %45 = vector.load %arg7[%c0_55, %c0_56, %c0_57, %c0_58, %c0_59] : memref<1x1x16x16x32xf32, #tpu.memory_space<vmem>>, vector<1x1x16x16x32xf32>
      %46 = vector.shape_cast %45 : vector<1x1x16x16x32xf32> to vector<16x16x32xf32>
      %47 = vector.shape_cast %44 : vector<16x16x32xf32> to vector<1x1x16x16x32xf32>
      tpu.vector_store %arg7[%c0_55, %c0_56, %c0_57, %c0_58, %c0_59], %47 {strides = array<i32>} : memref<1x1x16x16x32xf32, #tpu.memory_space<vmem>>, vector<1x1x16x16x32xf32>,
    } else {
    }
    return
  }
  func.func @transform_0(%arg0: i32, %arg1: i32, %arg2: i32, %arg3: i32) -> (i32, i32, i32, i32, i32) {
    %0 = arith.addi %arg1, %arg3 : i32
    %c0_i32 = arith.constant 0 : i32
    %c0_i32_0 = arith.constant 0 : i32
    %c0_i32_1 = arith.constant 0 : i32
    %c0_i32_2 = arith.constant 0 : i32
    return %arg0, %0, %c0_i32, %c0_i32_0, %c0_i32_1 : i32, i32, i32, i32, i32
  }
  func.func @transform_1(%arg0: i32, %arg1: i32, %arg2: i32, %arg3: i32) -> (i32, i32, i32) {
    %c0_i32 = arith.constant 0 : i32
    %c0_i32_0 = arith.constant 0 : i32
    return %arg3, %c0_i32, %arg2 : i32, i32, i32
  }
  func.func @transform_2(%arg0: i32, %arg1: i32, %arg2: i32, %arg3: i32) -> (i32, i32) {
    %c0_i32 = arith.constant 0 : i32
    %c0_i32_0 = arith.constant 0 : i32
    return %c0_i32, %arg2 : i32, i32
  }
  func.func @transform_3(%arg0: i32, %arg1: i32, %arg2: i32, %arg3: i32) -> (i32, i32, i32, i32, i32) {
    %c0_i32 = arith.constant 0 : i32
    %c0_i32_0 = arith.constant 0 : i32
    %c0_i32_1 = arith.constant 0 : i32
    return %arg0, %arg1, %c0_i32, %c0_i32_0, %arg2 : i32, i32, i32, i32, i32
  }
}

</mosaic_0001>

<bundles_post_ra>
// kernel: tpu_custom_call.1
= control target key start
LH: loop header
LB: loop body
LE: loop exit
PB: predicated region body
PF: predicated region fallthrough
CT: control target
= control target key end

     0   :  { %8 = vsyncpa [#allocation4], 0  ;;  %s4791_s0 = inlined_call_operand.vmem [shape: f32[1,4,18,18,2], index: 0, kind: input, shape index: {}]   ;;  %s4792_s1 = inlined_call_operand.vmem [shape: f32[3,18,32], index: 1, kind: input, shape index: {}]   ;;  %s4793_s2 = inlined_call_operand.vmem [shape: f32[1,32], index: 2, kind: input, shape index: {}]   ;;  %s4794_s3 = inlined_call_operand.hbm [shape: f32[1,2,16,16,32], index: 3, kind: output, shape index: {}]  }
   0x1   :  { %10 = vsyncpa [#allocation4 + $0x1], 0  ;;  %s3098_s12 = smov 0   ;;  %s3100_s13 = smov 0  }
   0x2   :  { %s3102_s14 = smov 0   ;;  %s3104_s15 = smov 0  }
   0x3   :  { %s3106_s16 = smov 0   ;;  %s3108_s17 = smov 0  }
   0x4   :  { %s3110_s18 = smov 0   ;;  %s3112_s19 = smov 0  }
   0x5 LB: > { %s2552_s20 = sadd.s32 4294967295, %s3065_s19   ;;  %s2553_s21 = sadd.s32 4294967294, %s3065_s19   ;;  %s3065_s19 = sphi %s3112_s19, %s16_s19   ;;  %s3061_s18 = sphi %s3110_s18, %s4962_s18   ;;  %s3057_s17 = sphi %s3108_s17, %s4961_s17   ;;  %s3053_s16 = sphi %s3106_s16, %s4960_s16   ;;  %s3049_s15 = sphi %s3104_s15, %s4959_s15   ;;  %s3045_s14 = sphi %s3102_s14, %s4958_s14   ;;  %s3041_s13 = sphi %s3100_s13, %s4957_s13   ;;  %s3037_s12 = sphi %s3098_s12, %s4956_s12  }
   0x6   : > { %s31_s22 = sadd.s32 1, %s3057_s17  ;;  %s38_s23 = sadd.s32 1, %s3061_s18 }
   0x7   : > { %p32_p0 = scmp.ge.s32.totalorder %s31_s22, 3  ;;  %p147_p1 = scmp.ne.s32.totalorder %s3045_s14, %s3041_s13 }
   0x8   : > { %p148_p2 = scmp.eq.s32.totalorder %s2552_s20, 5  ;;  %p153_p4 = scmp.ne.s32.totalorder %s3041_s13, %s3037_s12 }
   0x9   : > { %s4964_s22 = smov (%p32_p0, %s31_s22), 0  ;;  %s4966_s23 = smov (!%p32_p0, %s38_s23), %s3061_s18 }
   0xa   : > { %p3147_p3 = por %p148_p2, %p147_p1  ;;  %p40_p5 = scmp.ge.s32.totalorder %s4966_s23, 2 }
   0xb   : > { %p154_p6 = scmp.eq.s32.totalorder %s2553_s21, 5  ;;  %p2557_p7 = scmp.ge.s32.totalorder %s3065_s19, 1 }
   0xc   : > { %p203_p8 = scmp.lt.s32.totalorder %s3065_s19, 7  ;;  %s4968_s23 = smov (%p40_p5, %s4966_s23), 0 }
   0xd   : > { %p3157_p9 = por %p154_p6, %p153_p4  ;;  %s131_s26 = ssub.s32 %s3061_s18, %s4968_s23 }
   0xe   : > { %p204_p10 = pnand %p2557_p7, %p203_p8  ;;  %s137_s27 = sadd.s32 1, %s3045_s14 }
   0xf   : > { %p135_p11 = scmp.eq.s32.totalorder %s131_s26, 0 }
  0x10   : > { %207 = sbr.rel (%p204_p10) target bundleno = 917 (0x395), region = 32 }
  0x11   : > { %s3165_s28 = scalar_select %p135_p11, %s3045_s14, %s137_s27  }
  0x15   : > { %s240_s29 = sand.u32 1, %s3041_s13   ;;  %s243_s30 = sadd.s32 %s3049_s15, %s3053_s16 }
  0x16   : > { %s2558_s4 = sshll.u32 %s240_s29, 8  ;;  %p246_p12 = scmp.lt.s32.totalorder %s243_s30, 3 }
  0x17   : > { %p254_p13 = scmp.lt.s32.totalorder %s3049_s15, 2  ;;  %s3184_s26 = scalar_lea.vmem [#allocation3], %s2558_s4 }
  0x18   : > { %s4970_s30 = smov (!%p246_p12, %s243_s30), 3  ;;  %p2561_p0 = scmp.ne.s32.totalorder %s3049_s15, 0 }
  0x19   : > { %s255_s5 = scalar_select %p254_p13, %s3049_s15, 2 }
  0x1a   : > { %s2890_s6 = smul.u32 432, %s4970_s30 }
  0x1b   : > { %s2891_s7 = smul.u32 24, %s255_s5 }
  0x1c   : > { %s3177_s10 = scalar_lea.vmem %s4791_s0, %s2890_s6  ;;  %268 = sbr.rel (%p2561_p0) target bundleno = 50 (0x32), region = 36 }
  0x1d   : > { %s3182_s21 = scalar_lea.vmem %s4792_s1, %s2891_s7 }
  0x21   : > { %vm269_vm0 = vcmask 261120   ;;  %v3067_v0 = vmov 0.0  }
  0x22   : > { %270 = vst.msk [vmem:[#allocation2] sm:$0xff] %vm269_vm0, %v3067_v0  ;;  %271 = vst.msk [vmem:[#allocation2 + $0x8] sm:$0xff] %vm269_vm0, %v3067_v0 }
  0x23   : > { %272 = vst.msk [vmem:[#allocation2 + $0x10] sm:$0xff] %vm269_vm0, %v3067_v0  ;;  %273 = vst.msk [vmem:[#allocation2 + $0x18] sm:$0xff] %vm269_vm0, %v3067_v0 }
  0x24   : > { %274 = vst.msk [vmem:[#allocation2 + $0x20] sm:$0xff] %vm269_vm0, %v3067_v0  ;;  %275 = vst.msk [vmem:[#allocation2 + $0x28] sm:$0xff] %vm269_vm0, %v3067_v0 }
  0x25   : > { %276 = vst.msk [vmem:[#allocation2 + $0x30] sm:$0xff] %vm269_vm0, %v3067_v0  ;;  %277 = vst.msk [vmem:[#allocation2 + $0x38] sm:$0xff] %vm269_vm0, %v3067_v0 }
  0x26   : > { %278 = vst.msk [vmem:[#allocation2 + $0x40] sm:$0xff] %vm269_vm0, %v3067_v0  ;;  %279 = vst.msk [vmem:[#allocation2 + $0x48] sm:$0xff] %vm269_vm0, %v3067_v0 }
  0x27   : > { %280 = vst.msk [vmem:[#allocation2 + $0x50] sm:$0xff] %vm269_vm0, %v3067_v0  ;;  %281 = vst.msk [vmem:[#allocation2 + $0x58] sm:$0xff] %vm269_vm0, %v3067_v0 }
  0x28   : > { %282 = vst.msk [vmem:[#allocation2 + $0x60] sm:$0xff] %vm269_vm0, %v3067_v0  ;;  %283 = vst.msk [vmem:[#allocation2 + $0x68] sm:$0xff] %vm269_vm0, %v3067_v0 }
  0x29   : > { %284 = vst.msk [vmem:[#allocation2 + $0x70] sm:$0xff] %vm269_vm0, %v3067_v0  ;;  %285 = vst.msk [vmem:[#allocation2 + $0x78] sm:$0xff] %vm269_vm0, %v3067_v0 }
  0x2a   : > { %286 = vst.msk [vmem:[#allocation2 + $0x80] sm:$0xff] %vm269_vm0, %v3067_v0  ;;  %287 = vst.msk [vmem:[#allocation2 + $0x88] sm:$0xff] %vm269_vm0, %v3067_v0 }
  0x2b   : > { %288 = vst.msk [vmem:[#allocation2 + $0x90] sm:$0xff] %vm269_vm0, %v3067_v0  ;;  %289 = vst.msk [vmem:[#allocation2 + $0x98] sm:$0xff] %vm269_vm0, %v3067_v0 }
  0x2c   : > { %290 = vst.msk [vmem:[#allocation2 + $0xa0] sm:$0xff] %vm269_vm0, %v3067_v0  ;;  %291 = vst.msk [vmem:[#allocation2 + $0xa8] sm:$0xff] %vm269_vm0, %v3067_v0 }
  0x2d   : > { %292 = vst.msk [vmem:[#allocation2 + $0xb0] sm:$0xff] %vm269_vm0, %v3067_v0  ;;  %293 = vst.msk [vmem:[#allocation2 + $0xb8] sm:$0xff] %vm269_vm0, %v3067_v0 }
  0x2e   : > { %294 = vst.msk [vmem:[#allocation2 + $0xc0] sm:$0xff] %vm269_vm0, %v3067_v0  ;;  %295 = vst.msk [vmem:[#allocation2 + $0xc8] sm:$0xff] %vm269_vm0, %v3067_v0 }
  0x2f   : > { %296 = vst.msk [vmem:[#allocation2 + $0xd0] sm:$0xff] %vm269_vm0, %v3067_v0  ;;  %297 = vst.msk [vmem:[#allocation2 + $0xd8] sm:$0xff] %vm269_vm0, %v3067_v0 }
  0x30   : > { %298 = vst.msk [vmem:[#allocation2 + $0xe0] sm:$0xff] %vm269_vm0, %v3067_v0  ;;  %299 = vst.msk [vmem:[#allocation2 + $0xe8] sm:$0xff] %vm269_vm0, %v3067_v0 }
  0x31   : > { %300 = vst.msk [vmem:[#allocation2 + $0xf0] sm:$0xff] %vm269_vm0, %v3067_v0  ;;  %301 = vst.msk [vmem:[#allocation2 + $0xf8] sm:$0xff] %vm269_vm0, %v3067_v0 }
  0x32 PF: > { %v3220_v1 = vld [vmem:[%s3177_s10 + $0x19] sm:$0xff]  ;;  %v366_v2 = vld [vmem:[%s3177_s10 + $0x1] sm:$0xff]  ;;  %s3068_s27 = smov 2   ;;  %v367_v4 = vld [vmem:[%s3177_s10 + $0x9] sm:$0xff]  ;;  %s3069_s30 = smov 4   ;;  %vm1648_vm1 = vcmask 15360  }
  0x33   : > { %660 = vrot.lane.b32.xlu1 %v3220_v1, %s3068_s27  ;;  %656 = vrot.lane.b32.xlu0 %v366_v2, %s3068_s27  ;;  %v3227_v3 = vld [vmem:[%s3177_s10 + $0x21] sm:$0xff]  ;;  %v3234_v5 = vld [vmem:[%s3177_s10 + $0x39] sm:$0xff]  ;;  %s3070_s4 = smov 6   ;;  %vm1681_vm2 = vcmask 31744   ;;  %s3071_s5 = smov 8   ;;  %vm2012_vm3 = vcmask 1041408  }
  0x34   : > { %v3237_v6 = vld [vmem:[%s3177_s10 + $0x31] sm:$0xff]  ;;  %v3247_v8 = vld [vmem:[%s3177_s10 + $0x49] sm:$0xff]  ;;  %v3257_v10 = vld [vmem:[%s3177_s10 + $0x61] sm:$0xff]  ;;  %s3072_s6 = smov 10   ;;  %s3073_s7 = smov 12   ;;  %vm1714_vm4 = vcmask 48128  }
  0x35   : > { %v3244_v7 = vld [vmem:[%s3177_s10 + $0x51] sm:$0xff]  ;;  %v3254_v9 = vld [vmem:[%s3177_s10 + $0x69] sm:$0xff]  ;;  %v3264_v11 = vld [vmem:[%s3177_s10 + $0x81] sm:$0xff]  ;;  %s3074_s8 = smov 14   ;;  %s3075_s9 = smov 16   ;;  %vm1747_vm5 = vcmask 64512  }
  0x36   : > { %v3267_v12 = vld [vmem:[%s3177_s10 + $0x79] sm:$0xff]  ;;  %v3277_v14 = vld [vmem:[%s3177_s10 + $0x91] sm:$0xff]  ;;  %v3287_v16 = vld [vmem:[%s3177_s10 + $0xa9] sm:$0xff]  ;;  %vm1780_vm6 = vcmask 80896   ;;  %vm1813_vm7 = vcmask 97280   ;;  %vm1846_vm8 = vcmask 113664  }
  0x37   : > { %662 = vrot.lane.b32.xlu1 %v3227_v3, %s3068_s27  ;;  %658 = vrot.lane.b32.xlu0 %v367_v4, %s3068_s27  ;;  %v3274_v13 = vld [vmem:[%s3177_s10 + $0x99] sm:$0xff]  ;;  %v3284_v15 = vld [vmem:[%s3177_s10 + $0xb1] sm:$0xff]  ;;  %vm1879_vm9 = vcmask 130048   ;;  %vm1915_vm10 = vcmask 146432   ;;  %vm2273_vm11 = vcmask 261120   ;;  %p2787_p1 = scmp.ne.s32.totalorder %s3049_s15, 2 }
  0x38   : > { %v3294_v17 = vld [vmem:[%s3177_s10 + $0xc9] sm:$0xff]  ;;  %v3297_v18 = vld [vmem:[%s3177_s10 + $0xc1] sm:$0xff]  ;;  %v3307_v20 = vld [vmem:[%s3177_s10 + $0xd9] sm:$0xff] }
  0x39   : > { %v3304_v19 = vld [vmem:[%s3177_s10 + $0xe1] sm:$0xff]  ;;  %v3314_v21 = vld [vmem:[%s3177_s10 + $0xf9] sm:$0xff]  ;;  %v3317_v22 = vld [vmem:[%s3177_s10 + $0xf1] sm:$0xff] }
  0x3a   : > { %4838 = vst [vmem:[#allocation6_spill] sm:$0xff] %v3314_v21  ;;  %4839 = vst [vmem:[#allocation7_spill] sm:$0xff] %v3317_v22  ;;  %v3324_v23 = vld [vmem:[%s3177_s10 + $0x111] sm:$0xff]  ;;  %v3327_v24 = vld [vmem:[%s3177_s10 + $0x109] sm:$0xff] }
  0x3b   : > { %666 = vrot.lane.b32.xlu1 %v3234_v5, %s3068_s27  ;;  %664 = vrot.lane.b32.xlu0 %v3237_v6, %s3068_s27  ;;  %4840 = vst [vmem:[#allocation8_spill] sm:$0xff] %v3324_v23  ;;  %4841 = vst [vmem:[#allocation9_spill] sm:$0xff] %v3327_v24  ;;  %v391_v25 = vld [vmem:[%s3177_s10 + $0x129] sm:$0xff]  ;;  %v390_v26 = vld [vmem:[%s3177_s10 + $0x121] sm:$0xff] }
  0x3c   : > { %v393_v27 = vld [vmem:[%s3177_s10 + $0x141] sm:$0xff]  ;;  %v392_v28 = vld [vmem:[%s3177_s10 + $0x139] sm:$0xff]  ;;  %v394_v30 = vld [vmem:[%s3177_s10 + $0x151] sm:$0xff] }
  0x3d   : > { %v395_v29 = vld [vmem:[%s3177_s10 + $0x159] sm:$0xff]  ;;  %v397_v31 = vld [vmem:[%s3177_s10 + $0x171] sm:$0xff]  ;;  %v396_v32 = vld [vmem:[%s3177_s10 + $0x169] sm:$0xff] }
  0x3e   : > { %v399_v33 = vld [vmem:[%s3177_s10 + $0xa] sm:$0xff]  ;;  %v398_v34 = vld [vmem:[%s3177_s10 + $0x2] sm:$0xff]  ;;  %v3357_v36 = vld [vmem:[%s3177_s10 + $0x1a] sm:$0xff] }
  0x3f   : > { %670 = vrot.lane.b32.xlu1 %v3244_v7, %s3068_s27  ;;  %668 = vrot.lane.b32.xlu0 %v3247_v8, %s3068_s27  ;;  %v3354_v35 = vld [vmem:[%s3177_s10 + $0x22] sm:$0xff]  ;;  %v3364_v37 = vld [vmem:[%s3177_s10 + $0x3a] sm:$0xff] }
  0x40   : > { %4842 = vst [vmem:[#allocation10_spill] sm:$0xff] %v3354_v35  ;;  %4843 = vst [vmem:[#allocation11_spill] sm:$0xff] %v3364_v37  ;;  %v3367_v38 = vld [vmem:[%s3177_s10 + $0x32] sm:$0xff]  ;;  %v3377_v40 = vld [vmem:[%s3177_s10 + $0x4a] sm:$0xff] }
  0x41   : > { %4844 = vst [vmem:[#allocation12_spill] sm:$0xff] %v3367_v38  ;;  %v3374_v39 = vld [vmem:[%s3177_s10 + $0x52] sm:$0xff]  ;;  %4846 = vst [vmem:[#allocation14_spill] sm:$0xff] %v3377_v40  ;;  %v407_v41 = vld [vmem:[%s3177_s10 + $0x6a] sm:$0xff] }
  0x42   : > { %4845 = vst [vmem:[#allocation13_spill] sm:$0xff] %v3374_v39  ;;  %v3385_v42 = vld [vmem:[%s3177_s10 + $0x62] sm:$0xff]  ;;  %v408_v44 = vld [vmem:[%s3177_s10 + $0x7a] sm:$0xff]  ;;  %v410_v46 = vld [vmem:[%s3177_s10 + $0x92] sm:$0xff] }
  0x43   : > { %674 = vrot.lane.b32.xlu1 %v3254_v9, %s3068_s27  ;;  %672 = vrot.lane.b32.xlu0 %v3257_v10, %s3068_s27  ;;  %4847 = vst [vmem:[#allocation15_spill] sm:$0xff] %v3385_v42  ;;  %v409_v43 = vld [vmem:[%s3177_s10 + $0x82] sm:$0xff]  ;;  %v411_v45 = vld [vmem:[%s3177_s10 + $0x9a] sm:$0xff] }
  0x44   : > { %v413_v47 = vld [vmem:[%s3177_s10 + $0xb2] sm:$0xff]  ;;  %v412_v48 = vld [vmem:[%s3177_s10 + $0xaa] sm:$0xff]  ;;  %v414_v50 = vld [vmem:[%s3177_s10 + $0xc2] sm:$0xff] }
  0x45   : > { %v415_v49 = vld [vmem:[%s3177_s10 + $0xca] sm:$0xff]  ;;  %v3407_v51 = vld [vmem:[%s3177_s10 + $0xe2] sm:$0xff]  ;;  %v3410_v52 = vld [vmem:[%s3177_s10 + $0xda] sm:$0xff] }
  0x46   : > { %4848 = vst [vmem:[#allocation16_spill] sm:$0xff] %v3407_v51  ;;  %v3417_v53 = vld [vmem:[%s3177_s10 + $0xfa] sm:$0xff]  ;;  %v3420_v54 = vld [vmem:[%s3177_s10 + $0xf2] sm:$0xff]  ;;  %v3430_v56 = vld [vmem:[%s3177_s10 + $0x10a] sm:$0xff] }
  0x47   : > { %678 = vrot.lane.b32.xlu1 %v3264_v11, %s3068_s27  ;;  %676 = vrot.lane.b32.xlu0 %v3267_v12, %s3068_s27  ;;  %4849 = vst [vmem:[#allocation17_spill] sm:$0xff] %v3417_v53  ;;  %4850 = vst [vmem:[#allocation18_spill] sm:$0xff] %v3420_v54  ;;  %v3427_v55 = vld [vmem:[%s3177_s10 + $0x112] sm:$0xff]  ;;  %v3437_v57 = vld [vmem:[%s3177_s10 + $0x12a] sm:$0xff] }
  0x48   : > { %4851 = vst [vmem:[#allocation19_spill] sm:$0xff] %v3427_v55  ;;  %4852 = vst [vmem:[#allocation20_spill] sm:$0xff] %v3430_v56  ;;  %v3440_v58 = vld [vmem:[%s3177_s10 + $0x122] sm:$0xff]  ;;  %v424_v60 = vld [vmem:[%s3177_s10 + $0x13a] sm:$0xff] }
  0x49   : > { %4853 = vst [vmem:[#allocation21_spill] sm:$0xff] %v3437_v57  ;;  %4854 = vst [vmem:[#allocation22_spill] sm:$0xff] %v3440_v58  ;;  %v425_v59 = vld [vmem:[%s3177_s10 + $0x142] sm:$0xff]  ;;  %v427_v63 = vld [vmem:[%s3177_s10 + $0x15a] sm:$0xff] }
  0x4a   : > { %v426_v0 = vld [vmem:[%s3177_s10 + $0x152] sm:$0xff] }
  0x4b   : > { %682 = vrot.lane.b32.xlu1 %v3274_v13, %s3068_s27  ;;  %680 = vrot.lane.b32.xlu0 %v3277_v14, %s3068_s27 }
  0x4f   : > { %686 = vrot.lane.b32.xlu1 %v3284_v15, %s3068_s27  ;;  %684 = vrot.lane.b32.xlu0 %v3287_v16, %s3068_s27 }
  0x53   : > { %690 = vrot.lane.b32.xlu1 %v3294_v17, %s3068_s27  ;;  %688 = vrot.lane.b32.xlu0 %v3297_v18, %s3068_s27 }
  0x57   : > { %694 = vrot.lane.b32.xlu1 %v3304_v19, %s3068_s27  ;;  %692 = vrot.lane.b32.xlu0 %v3307_v20, %s3068_s27 }
  0x5b   : > { %698 = vrot.lane.b32.xlu1 %v3314_v21, %s3068_s27  ;;  %696 = vrot.lane.b32.xlu0 %v3317_v22, %s3068_s27  ;;  %v3636_v22 = vld [vmem:[%s3177_s10 + $0x138] sm:$0xff] }
  0x5f   : > { %702 = vrot.lane.b32.xlu1 %v3324_v23, %s3068_s27  ;;  %700 = vrot.lane.b32.xlu0 %v3327_v24, %s3068_s27  ;;  %v3624_v24 = vld [vmem:[%s3177_s10 + $0x120] sm:$0xff] }
  0x63   : > { %706 = vrot.lane.b32.xlu1 %v391_v25, %s3068_s27  ;;  %704 = vrot.lane.b32.xlu0 %v390_v26, %s3068_s27  ;;  %v429_v25 = vld [vmem:[%s3177_s10 + $0x172] sm:$0xff]  ;;  %v428_v26 = vld [vmem:[%s3177_s10 + $0x16a] sm:$0xff] }
  0x67   : > { %710 = vrot.lane.b32.xlu1 %v393_v27, %s3068_s27  ;;  %708 = vrot.lane.b32.xlu0 %v392_v28, %s3068_s27 }
  0x6b   : > { %714 = vrot.lane.b32.xlu1 %v395_v29, %s3068_s27  ;;  %712 = vrot.lane.b32.xlu0 %v394_v30, %s3068_s27 }
  0x6f   : > { %718 = vrot.lane.b32.xlu1 %v397_v31, %s3068_s27  ;;  %716 = vrot.lane.b32.xlu0 %v396_v32, %s3068_s27  ;;  %v3475_v31 = vld [vmem:[%s3177_s10 + $0x18] sm:$0xff]  ;;  %v3478_v32 = vld [vmem:[%s3177_s10 + $0x20] sm:$0xff] }
  0x70   : > { %4859 = vst [vmem:[#allocation27_spill] sm:$0xff] %v3475_v31  ;;  %4860 = vst [vmem:[#allocation28_spill] sm:$0xff] %v3478_v32 }
  0x73   : > { %786 = vrot.lane.b32.xlu1 %v399_v33, %s3069_s30  ;;  %784 = vrot.lane.b32.xlu0 %v398_v34, %s3069_s30 }
  0x77   : > { %790 = vrot.lane.b32.xlu1 %v3354_v35, %s3069_s30  ;;  %788 = vrot.lane.b32.xlu0 %v3357_v36, %s3069_s30 }
  0x7b   : > { %794 = vrot.lane.b32.xlu1 %v3364_v37, %s3069_s30  ;;  %792 = vrot.lane.b32.xlu0 %v3367_v38, %s3069_s30  ;;  %v365_v37 = vld [vmem:[%s3177_s10 + $0x170] sm:$0xff]  ;;  %v3633_v38 = vld [vmem:[%s3177_s10 + $0x140] sm:$0xff] }
  0x7f   : > { %798 = vrot.lane.b32.xlu1 %v3374_v39, %s3069_s30  ;;  %796 = vrot.lane.b32.xlu0 %v3377_v40, %s3069_s30  ;;  %v3607_v39 = vld [vmem:[%s3177_s10 + $0x110] sm:$0xff]  ;;  %v3621_v40 = vld [vmem:[%s3177_s10 + $0x128] sm:$0xff] }
  0x83   : > { %802 = vrot.lane.b32.xlu1 %v407_v41, %s3069_s30  ;;  %800 = vrot.lane.b32.xlu0 %v3385_v42, %s3069_s30  ;;  %v3489_v41 = vld [vmem:[%s3177_s10 + $0x38] sm:$0xff]  ;;  %v3568_v42 = vld [vmem:[%s3177_s10 + $0xc0] sm:$0xff] }
  0x84   : > { %4866 = vst [vmem:[#allocation34_spill] sm:$0xff] %v3568_v42 }
  0x87   : > { %806 = vrot.lane.b32.xlu1 %v409_v43, %s3069_s30  ;;  %804 = vrot.lane.b32.xlu0 %v408_v44, %s3069_s30  ;;  %v3492_v43 = vld [vmem:[%s3177_s10 + $0x30] sm:$0xff] }
  0x8b   : > { %810 = vrot.lane.b32.xlu1 %v411_v45, %s3069_s30  ;;  %808 = vrot.lane.b32.xlu0 %v410_v46, %s3069_s30  ;;  %v3503_v46 = vld [vmem:[%s3177_s10 + $0x50] sm:$0xff] }
  0x8f   : > { %814 = vrot.lane.b32.xlu1 %v413_v47, %s3069_s30  ;;  %812 = vrot.lane.b32.xlu0 %v412_v48, %s3069_s30  ;;  %v3506_v47 = vld [vmem:[%s3177_s10 + $0x48] sm:$0xff]  ;;  %v347_v48 = vld [vmem:[%s3177_s10 + $0x98] sm:$0xff] }
  0x93   : > { %818 = vrot.lane.b32.xlu1 %v415_v49, %s3069_s30  ;;  %816 = vrot.lane.b32.xlu0 %v414_v50, %s3069_s30  ;;  %v346_v49 = vld [vmem:[%s3177_s10 + $0x90] sm:$0xff] }
  0x97   : > { %822 = vrot.lane.b32.xlu1 %v3407_v51, %s3069_s30  ;;  %820 = vrot.lane.b32.xlu0 %v3410_v52, %s3069_s30 }
  0x9b   : > { %826 = vrot.lane.b32.xlu1 %v3417_v53, %s3069_s30  ;;  %824 = vrot.lane.b32.xlu0 %v3420_v54, %s3069_s30  ;;  %v364_v53 = vld [vmem:[%s3177_s10 + $0x168] sm:$0xff] }
  0x9f   : > { %830 = vrot.lane.b32.xlu1 %v3427_v55, %s3069_s30  ;;  %828 = vrot.lane.b32.xlu0 %v3430_v56, %s3069_s30  ;;  %v3610_v55 = vld [vmem:[%s3177_s10 + $0x108] sm:$0xff] }
  0xa3   : > { %834 = vrot.lane.b32.xlu1 %v3437_v57, %s3069_s30  ;;  %832 = vrot.lane.b32.xlu0 %v3440_v58, %s3069_s30 }
  0xa5   : > { %v3448_v61 = vpop.permute.xlu1 %660  ;;  %v3450_v62 = vpop.permute.xlu0 %656 }
  0xa6   : > { %4855 = vst [vmem:[#allocation23_spill] sm:$0xff] %v3448_v61  ;;  %4856 = vst [vmem:[#allocation24_spill] sm:$0xff] %v3450_v62  ;;  %v3533_v61 = vld [vmem:[%s3177_s10 + $0x80] sm:$0xff] }
  0xa7   : > { %838 = vrot.lane.b32.xlu1 %v425_v59, %s3069_s30  ;;  %836 = vrot.lane.b32.xlu0 %v424_v60, %s3069_s30  ;;  %v3515_v60 = vld [vmem:[%s3177_s10 + $0x68] sm:$0xff] }
  0xa9   : > { %v3456_v2 = vpop.permute.xlu1 %662  ;;  %v3458_v4 = vpop.permute.xlu0 %658 }
  0xaa   : > { %4857 = vst [vmem:[#allocation25_spill] sm:$0xff] %v3456_v2  ;;  %4858 = vst [vmem:[#allocation26_spill] sm:$0xff] %v3458_v4  ;;  %v3536_v4 = vld [vmem:[%s3177_s10 + $0x78] sm:$0xff] }
  0xab   : > { %842 = vrot.lane.b32.xlu1 %v427_v63, %s3069_s30  ;;  %840 = vrot.lane.b32.xlu0 %v426_v0, %s3069_s30  ;;  %v3518_v63 = vld [vmem:[%s3177_s10 + $0x60] sm:$0xff] }
  0xad   : > { %v3464_v27 = vpop.permute.xlu1 %666  ;;  %v3466_v28 = vpop.permute.xlu0 %664 }
  0xaf   : > { %846 = vrot.lane.b32.xlu1 %v429_v25, %s3069_s30  ;;  %844 = vrot.lane.b32.xlu0 %v428_v26, %s3069_s30  ;;  %v349_v26 = vld [vmem:[%s3177_s10 + $0xb0] sm:$0xff] }
  0xb1   : > { %v3470_v29 = vpop.permute.xlu1 %670  ;;  %v3472_v30 = vpop.permute.xlu0 %668 }
  0xb3   : > { %914 = vrot.lane.b32.xlu1 %v3478_v32, %s3070_s4  ;;  %912 = vrot.lane.b32.xlu0 %v3475_v31, %s3070_s4  ;;  %v348_v32 = vld [vmem:[%s3177_s10 + $0xa8] sm:$0xff] }
  0xb5   : > { %v3484_v33 = vpop.permute.xlu1 %674  ;;  %v3486_v34 = vpop.permute.xlu0 %672 }
  0xb7   : > { %918 = vrot.lane.b32.xlu1 %v3489_v41, %s3070_s4  ;;  %916 = vrot.lane.b32.xlu0 %v3492_v43, %s3070_s4 }
  0xb9   : > { %v3498_v44 = vpop.permute.xlu1 %678  ;;  %v3500_v45 = vpop.permute.xlu0 %676 }
  0xbb   : > { %922 = vrot.lane.b32.xlu1 %v3503_v46, %s3070_s4  ;;  %920 = vrot.lane.b32.xlu0 %v3506_v47, %s3070_s4 }
  0xbd   : > { %v683_v50 = vpop.permute.xlu1 %682  ;;  %v681_v59 = vpop.permute.xlu0 %680 }
  0xbe   : > { %v3521_v0 = vsel %vm1648_vm1, %v347_v48, %v683_v50  ;;  %v3524_v25 = vsel %vm1648_vm1, %v346_v49, %v681_v59 }
  0xbf   : > { %926 = vrot.lane.b32.xlu1 %v3515_v60, %s3070_s4  ;;  %924 = vrot.lane.b32.xlu0 %v3518_v63, %s3070_s4 }
  0xc1   : > { %v687_v2 = vpop.permute.xlu1 %686  ;;  %v685_v31 = vpop.permute.xlu0 %684 }
  0xc2   : > { %v3539_v50 = vsel %vm1648_vm1, %v349_v26, %v687_v2  ;;  %v3542_v59 = vsel %vm1648_vm1, %v348_v32, %v685_v31 }
  0xc3   : > { %930 = vrot.lane.b32.xlu1 %v3533_v61, %s3070_s4  ;;  %928 = vrot.lane.b32.xlu0 %v3536_v4, %s3070_s4 }
  0xc5   : > { %v3548_v62 = vpop.permute.xlu1 %690  ;;  %v3550_v57 = vpop.permute.xlu0 %688 }
  0xc6   : > { %4861 = vst [vmem:[#allocation29_spill] sm:$0xff] %v3548_v62  ;;  %4862 = vst [vmem:[#allocation30_spill] sm:$0xff] %v3550_v57  ;;  %v3565_v57 = vld [vmem:[%s3177_s10 + $0xc8] sm:$0xff] }
  0xc7   : > { %934 = vrot.lane.b32.xlu1 %v347_v48, %s3070_s4  ;;  %932 = vrot.lane.b32.xlu0 %v346_v49, %s3070_s4  ;;  %4865 = vst [vmem:[#allocation33_spill] sm:$0xff] %v3565_v57  ;;  %v3579_v49 = vld [vmem:[%s3177_s10 + $0xe0] sm:$0xff] }
  0xc8   : > { %4867 = vst [vmem:[#allocation35_spill] sm:$0xff] %v3579_v49 }
  0xc9   : > { %v3554_v2 = vpop.permute.xlu1 %694  ;;  %v3556_v31 = vpop.permute.xlu0 %692 }
  0xca   : > { %4863 = vst [vmem:[#allocation31_spill] sm:$0xff] %v3554_v2  ;;  %4864 = vst [vmem:[#allocation32_spill] sm:$0xff] %v3556_v31 }
  0xcb   : > { %938 = vrot.lane.b32.xlu1 %v349_v26, %s3070_s4  ;;  %936 = vrot.lane.b32.xlu0 %v348_v32, %s3070_s4  ;;  %v3582_v26 = vld [vmem:[%s3177_s10 + $0xd8] sm:$0xff] }
  0xcc   : > { %4868 = vst [vmem:[#allocation36_spill] sm:$0xff] %v3582_v26 }
  0xcd   : > { %v3560_v58 = vpop.permute.xlu1 %698  ;;  %v3562_v62 = vpop.permute.xlu0 %696 }
  0xcf   : > { %942 = vrot.lane.b32.xlu1 %v3565_v57, %s3070_s4  ;;  %940 = vrot.lane.b32.xlu0 %v3568_v42, %s3070_s4  ;;  %v3593_v57 = vld [vmem:[%s3177_s10 + $0xf8] sm:$0xff]  ;;  %v3596_v42 = vld [vmem:[%s3177_s10 + $0xf0] sm:$0xff] }
  0xd1   : > { %v3574_v48 = vpop.permute.xlu1 %702  ;;  %v3576_v32 = vpop.permute.xlu0 %700 }
  0xd3   : > { %946 = vrot.lane.b32.xlu1 %v3579_v49, %s3070_s4  ;;  %944 = vrot.lane.b32.xlu0 %v3582_v26, %s3070_s4 }
  0xd5   : > { %v3588_v2 = vpop.permute.xlu1 %706  ;;  %v3590_v31 = vpop.permute.xlu0 %704 }
  0xd7   : > { %950 = vrot.lane.b32.xlu1 %v3593_v57, %s3070_s4  ;;  %948 = vrot.lane.b32.xlu0 %v3596_v42, %s3070_s4 }
  0xd9   : > { %v3602_v49 = vpop.permute.xlu1 %710  ;;  %v3604_v26 = vpop.permute.xlu0 %708 }
  0xda   : > { %4869 = vst [vmem:[#allocation37_spill] sm:$0xff] %v3602_v49  ;;  %4870 = vst [vmem:[#allocation38_spill] sm:$0xff] %v3604_v26  ;;  %v3653_v26 = vld [vmem:[%s3177_s10 + $0x158] sm:$0xff]  ;;  %v3656_v49 = vld [vmem:[%s3177_s10 + $0x150] sm:$0xff] }
  0xdb   : > { %954 = vrot.lane.b32.xlu1 %v3607_v39, %s3070_s4  ;;  %952 = vrot.lane.b32.xlu0 %v3610_v55, %s3070_s4  ;;  %4877 = vst [vmem:[#allocation45_spill] sm:$0xff] %v3653_v26  ;;  %4878 = vst [vmem:[#allocation46_spill] sm:$0xff] %v3656_v49 }
  0xdd   : > { %v3616_v56 = vpop.permute.xlu1 %714  ;;  %v3618_v23 = vpop.permute.xlu0 %712 }
  0xde   : > { %4871 = vst [vmem:[#allocation39_spill] sm:$0xff] %v3616_v56  ;;  %4872 = vst [vmem:[#allocation40_spill] sm:$0xff] %v3618_v23 }
  0xdf   : > { %958 = vrot.lane.b32.xlu1 %v3621_v40, %s3070_s4  ;;  %956 = vrot.lane.b32.xlu0 %v3624_v24, %s3070_s4 }
  0xe1   : > { %v719_v54 = vpop.permute.xlu1 %718  ;;  %v717_v21 = vpop.permute.xlu0 %716 }
  0xe2   : > { %v3639_v23 = vsel %vm1648_vm1, %v365_v37, %v719_v54  ;;  %v3642_v56 = vsel %vm1648_vm1, %v364_v53, %v717_v21 }
  0xe3   : > { %4873 = vst [vmem:[#allocation41_spill] sm:$0xff] %v3639_v23  ;;  %4874 = vst [vmem:[#allocation42_spill] sm:$0xff] %v3642_v56  ;;  %962 = vrot.lane.b32.xlu1 %v3633_v38, %s3070_s4  ;;  %960 = vrot.lane.b32.xlu0 %v3636_v22, %s3070_s4  ;;  %v1654_v56 = vsel %vm1648_vm1, %v3489_v41, %v3464_v27  ;;  %v1653_v23 = vsel %vm1648_vm1, %v3492_v43, %v3466_v28 }
  0xe4   : > { %v1655_v27 = vsel %vm1648_vm1, %v3506_v47, %v3472_v30 }
  0xe5   : > { %v3648_v35 = vpop.permute.xlu1 %786  ;;  %v3650_v51 = vpop.permute.xlu0 %784 }
  0xe6   : > { %4875 = vst [vmem:[#allocation43_spill] sm:$0xff] %v3648_v35  ;;  %4876 = vst [vmem:[#allocation44_spill] sm:$0xff] %v3650_v51  ;;  %v2593_v35 = vld [vmem:[%s3177_s10 + $0x188] sm:$0xff]  ;;  %v2592_v51 = vld [vmem:[%s3177_s10 + $0x180] sm:$0xff] }
  0xe7   : > { %966 = vrot.lane.b32.xlu1 %v3653_v26, %s3070_s4  ;;  %964 = vrot.lane.b32.xlu0 %v3656_v49, %s3070_s4 }
  0xe9   : > { %v3662_v21 = vpop.permute.xlu1 %790  ;;  %v3664_v54 = vpop.permute.xlu0 %788 }
  0xea   : > { %4879 = vst [vmem:[#allocation47_spill] sm:$0xff] %v3662_v21  ;;  %4880 = vst [vmem:[#allocation48_spill] sm:$0xff] %v3664_v54 }
  0xeb   : > { %970 = vrot.lane.b32.xlu1 %v365_v37, %s3070_s4  ;;  %968 = vrot.lane.b32.xlu0 %v364_v53, %s3070_s4  ;;  %v1656_v53 = vsel %vm1648_vm1, %v3503_v46, %v3470_v29 }
  0xed   : > { %v795_v49 = vpop.permute.xlu1 %794  ;;  %v793_v26 = vpop.permute.xlu0 %792 }
  0xee   : > { %v3677_v21 = vsel %vm1681_vm2, %v1654_v56, %v795_v49  ;;  %v3680_v37 = vsel %vm1681_vm2, %v1653_v23, %v793_v26 }
  0xef   : > { %974 = vrot.lane.b32.xlu1 %v2593_v35, %s3070_s4  ;;  %972 = vrot.lane.b32.xlu0 %v2592_v51, %s3070_s4  ;;  %v1658_v35 = vsel %vm1648_vm1, %v3515_v60, %v3484_v33  ;;  %v1657_v51 = vsel %vm1648_vm1, %v3518_v63, %v3486_v34 }
  0xf1   : > { %v799_v28 = vpop.permute.xlu1 %798  ;;  %v797_v54 = vpop.permute.xlu0 %796 }
  0xf2   : > { %v3691_v56 = vsel %vm1681_vm2, %v1656_v53, %v799_v28  ;;  %v3694_v23 = vsel %vm1681_vm2, %v1655_v27, %v797_v54 }
  0xf3   : > { %1042 = vrot.lane.b32.xlu1 %v3227_v3, %s3071_s5  ;;  %1040 = vrot.lane.b32.xlu0 %v3220_v1, %s3071_s5  ;;  %v1660_v1 = vsel %vm1648_vm1, %v3533_v61, %v3498_v44  ;;  %v1659_v3 = vsel %vm1648_vm1, %v3536_v4, %v3500_v45 }
  0xf5   : > { %v803_v29 = vpop.permute.xlu1 %802  ;;  %v801_v30 = vpop.permute.xlu0 %800 }
  0xf6   : > { %v3707_v49 = vsel %vm1681_vm2, %v1658_v35, %v803_v29  ;;  %v3710_v26 = vsel %vm1681_vm2, %v1657_v51, %v801_v30 }
  0xf7   : > { %1046 = vrot.lane.b32.xlu1 %v3234_v5, %s3071_s5  ;;  %1044 = vrot.lane.b32.xlu0 %v3237_v6, %s3071_s5 }
  0xf9   : > { %v807_v33 = vpop.permute.xlu1 %806  ;;  %v805_v34 = vpop.permute.xlu0 %804 }
  0xfa   : > { %v3723_v54 = vsel %vm1681_vm2, %v1660_v1, %v807_v33  ;;  %v3726_v53 = vsel %vm1681_vm2, %v1659_v3, %v805_v34 }
  0xfb   : > { %1050 = vrot.lane.b32.xlu1 %v3244_v7, %s3071_s5  ;;  %1048 = vrot.lane.b32.xlu0 %v3247_v8, %s3071_s5 }
  0xfd   : > { %v811_v27 = vpop.permute.xlu1 %810  ;;  %v809_v44 = vpop.permute.xlu0 %808 }
  0xfe   : > { %v3734_v28 = vsel %vm1681_vm2, %v3521_v0, %v811_v27  ;;  %v3738_v45 = vsel %vm1681_vm2, %v3524_v25, %v809_v44 }
  0xff   : > { %1054 = vrot.lane.b32.xlu1 %v3254_v9, %s3071_s5  ;;  %1052 = vrot.lane.b32.xlu0 %v3257_v10, %s3071_s5 }
 0x101   : > { %v815_v35 = vpop.permute.xlu1 %814  ;;  %v813_v51 = vpop.permute.xlu0 %812 }
 0x102   : > { %v3746_v29 = vsel %vm1681_vm2, %v3539_v50, %v815_v35  ;;  %v3750_v0 = vsel %vm1681_vm2, %v3542_v59, %v813_v51 }
 0x103   : > { %1058 = vrot.lane.b32.xlu1 %v3264_v11, %s3071_s5  ;;  %1056 = vrot.lane.b32.xlu0 %v3267_v12, %s3071_s5  ;;  %v1670_v11 = vsel %vm1648_vm1, %v3593_v57, %v3560_v58  ;;  %v1669_v12 = vsel %vm1648_vm1, %v3596_v42, %v3562_v62 }
 0x105   : > { %v3756_v9 = vpop.permute.xlu1 %818  ;;  %v3758_v25 = vpop.permute.xlu0 %816 }
 0x107   : > { %1062 = vrot.lane.b32.xlu1 %v3274_v13, %s3071_s5  ;;  %1060 = vrot.lane.b32.xlu0 %v3277_v14, %s3071_s5 }
 0x109   : > { %v3764_v10 = vpop.permute.xlu1 %822  ;;  %v3766_v50 = vpop.permute.xlu0 %820 }
 0x10b   : > { %1066 = vrot.lane.b32.xlu1 %v3284_v15, %s3071_s5  ;;  %1064 = vrot.lane.b32.xlu0 %v3287_v16, %s3071_s5  ;;  %v1672_v15 = vsel %vm1648_vm1, %v3607_v39, %v3574_v48  ;;  %v1671_v16 = vsel %vm1648_vm1, %v3610_v55, %v3576_v32 }
 0x10d   : > { %v827_v13 = vpop.permute.xlu1 %826  ;;  %v825_v14 = vpop.permute.xlu0 %824 }
 0x10e   : > { %v3779_v59 = vsel %vm1681_vm2, %v1670_v11, %v827_v13  ;;  %v3782_v30 = vsel %vm1681_vm2, %v1669_v12, %v825_v14  ;;  %v4885_v11 = vld [vmem:[#allocation39_spill] sm:$0xff]  ;;  %v4886_v12 = vld [vmem:[#allocation45_spill] sm:$0xff]  ;;  %v4887_v14 = vld [vmem:[#allocation40_spill] sm:$0xff] }
 0x10f   : > { %1070 = vrot.lane.b32.xlu1 %v3294_v17, %s3071_s5  ;;  %1068 = vrot.lane.b32.xlu0 %v3297_v18, %s3071_s5  ;;  %v1674_v17 = vsel %vm1648_vm1, %v3621_v40, %v3588_v2  ;;  %v1673_v18 = vsel %vm1648_vm1, %v3624_v24, %v3590_v31  ;;  %v4882_v2 = vld [vmem:[#allocation38_spill] sm:$0xff]  ;;  %v1678_v13 = vsel %vm1648_vm1, %v4886_v12, %v4885_v11 }
 0x110   : > { %v1675_v31 = vsel %vm1648_vm1, %v3636_v22, %v4882_v2  ;;  %v4890_v2 = vld [vmem:[#allocation42_spill] sm:$0xff] }
 0x111   : > { %v831_v58 = vpop.permute.xlu1 %830  ;;  %v829_v62 = vpop.permute.xlu0 %828 }
 0x112   : > { %v3795_v1 = vsel %vm1681_vm2, %v1672_v15, %v831_v58  ;;  %v3798_v3 = vsel %vm1681_vm2, %v1671_v16, %v829_v62  ;;  %v4888_v15 = vld [vmem:[#allocation46_spill] sm:$0xff] }
 0x113   : > { %1074 = vrot.lane.b32.xlu1 %v3304_v19, %s3071_s5  ;;  %1072 = vrot.lane.b32.xlu0 %v3307_v20, %s3071_s5  ;;  %v4881_v19 = vld [vmem:[#allocation37_spill] sm:$0xff]  ;;  %v1677_v16 = vsel %vm1648_vm1, %v4888_v15, %v4887_v14 }
 0x114   : > { %v1676_v20 = vsel %vm1648_vm1, %v3633_v38, %v4881_v19  ;;  %v4889_v19 = vld [vmem:[#allocation41_spill] sm:$0xff] }
 0x115   : > { %v835_v48 = vpop.permute.xlu1 %834  ;;  %v833_v32 = vpop.permute.xlu0 %832 }
 0x116   : > { %v3811_v33 = vsel %vm1681_vm2, %v1674_v17, %v835_v48  ;;  %v3814_v34 = vsel %vm1681_vm2, %v1673_v18, %v833_v32 }
 0x117   : > { %1200 = vrot.lane.b32.xlu1 %v3410_v52, %s3072_s6  ;;  %1168 = vrot.lane.b32.xlu0 %v3357_v36, %s3072_s6  ;;  %v4883_v52 = vld [vmem:[#allocation16_spill] sm:$0xff]  ;;  %v4884_v36 = vld [vmem:[#allocation10_spill] sm:$0xff] }
 0x119   : > { %v839_v27 = vpop.permute.xlu1 %838  ;;  %v837_v44 = vpop.permute.xlu0 %836 }
 0x11a   : > { %v3827_v35 = vsel %vm1681_vm2, %v1676_v20, %v839_v27  ;;  %v3830_v51 = vsel %vm1681_vm2, %v1675_v31, %v837_v44  ;;  %v4891_v27 = vld [vmem:[#allocation7_spill] sm:$0xff]  ;;  %v1914_v44 = vld [vmem:[%s3182_s21 + $0x10] sm:$0x3] }
 0x11b   : > { %1202 = vrot.lane.b32.xlu1 %v4883_v52, %s3072_s6  ;;  %1170 = vrot.lane.b32.xlu0 %v4884_v36, %s3072_s6  ;;  %v1912_v36 = vld [vmem:[%s3182_s21] sm:$0xff] }
 0x11c   : > { %2830 = vmatprep.subr.msk.mxu0 %vm2012_vm3, %v1914_v44  ;;  %2884 = vmatprep.subr.msk.mxu1 %vm2012_vm3, %v1914_v44 }
 0x11d   : > { %v843_v58 = vpop.permute.xlu1 %842  ;;  %v841_v62 = vpop.permute.xlu0 %840  ;;  %2831 = vmatpush3.msk.msra.mxu0 %vm2012_vm3, %v1914_v44  ;;  %2887 = vmatpush3.msk.msra.mxu1 %vm2012_vm3, %v1914_v44 }
 0x11e   : > { %v3843_v17 = vsel %vm1681_vm2, %v1678_v13, %v843_v58  ;;  %v3846_v18 = vsel %vm1681_vm2, %v1677_v16, %v841_v62  ;;  %v4893_v16 = vld [vmem:[#allocation6_spill] sm:$0xff] }
 0x11f   : > { %1328 = vrot.lane.b32.xlu1 %v3596_v42, %s3073_s7  ;;  %1296 = vrot.lane.b32.xlu0 %v3492_v43, %s3073_s7 }
 0x121   : > { %v847_v48 = vpop.permute.xlu1 %846  ;;  %v845_v32 = vpop.permute.xlu0 %844 }
 0x122   : > { %v3854_v20 = vsel %vm1681_vm2, %v4889_v19, %v847_v48  ;;  %v3858_v31 = vsel %vm1681_vm2, %v4890_v2, %v845_v32  ;;  %v4894_v48 = vld [vmem:[#allocation18_spill] sm:$0xff] }
 0x123   : > { %1330 = vrot.lane.b32.xlu1 %v3593_v57, %s3073_s7  ;;  %1298 = vrot.lane.b32.xlu0 %v3489_v41, %s3073_s7  ;;  %v1913_v41 = vld [vmem:[%s3182_s21 + $0x8] sm:$0xff] }
 0x124   : > { %2832 = vmatprep.subr.mxu0 %v1913_v41  ;;  %2885 = vmatprep.subr.mxu1 %v1913_v41 }
 0x125   : > { %v3864_v42 = vpop.permute.xlu1 %914  ;;  %v3866_v43 = vpop.permute.xlu0 %912  ;;  %2833 = vmatpush3.msra.mxu0 %v1913_v41  ;;  %2888 = vmatpush3.msra.mxu1 %v1913_v41  ;;  %v4896_v41 = vld [vmem:[#allocation17_spill] sm:$0xff] }
 0x126   : > { %2834 = vmatprep.subr.mxu0 %v1912_v36  ;;  %2886 = vmatprep.subr.mxu1 %v1912_v36 }
 0x127   : > { %1456 = vrot.lane.b32.xlu1 %v4891_v27, %s3074_s8  ;;  %1424 = vrot.lane.b32.xlu0 %v3237_v6, %s3074_s8 }
 0x128   : > { %2835 = vmatpush3.msra.mxu0 %v1912_v36  ;;  %2889 = vmatpush3.msra.mxu1 %v1912_v36 }
 0x129   : > { %v3873_v52 = vpop.permute.xlu1 %918  ;;  %v3875_v57 = vpop.permute.xlu0 %916 }
 0x12b   : > { %1426 = vrot.lane.b32.xlu1 %v3234_v5, %s3074_s8  ;;  %1076 = vrot.lane.b32.xlu0 %v4891_v27, %s3071_s5  ;;  %v4892_v5 = vld [vmem:[#allocation12_spill] sm:$0xff] }
 0x12d   : > { %v923_v6 = vpop.permute.xlu1 %922  ;;  %v921_v11 = vpop.permute.xlu0 %920 }
 0x12e   : > { %v3885_v13 = vsel %vm1714_vm4, %v3677_v21, %v923_v6  ;;  %v3889_v14 = vsel %vm1714_vm4, %v3680_v37, %v921_v11 }
 0x12f   : > { %1552 = vrot.lane.b32.xlu1 %v4892_v5, %s3075_s9  ;;  %1458 = vrot.lane.b32.xlu0 %v4893_v16, %s3074_s8 }
 0x131   : > { %v927_v58 = vpop.permute.xlu1 %926  ;;  %v925_v62 = vpop.permute.xlu0 %924 }
 0x132   : > { %v3897_v21 = vsel %vm1714_vm4, %v3691_v56, %v927_v58  ;;  %v3901_v37 = vsel %vm1714_vm4, %v3694_v23, %v925_v62  ;;  %v4902_v62 = vld [vmem:[#allocation9_spill] sm:$0xff] }
 0x133   : > { %1078 = vrot.lane.b32.xlu1 %v4893_v16, %s3071_s5  ;;  %1584 = vrot.lane.b32.xlu0 %v4894_v48, %s3075_s9 }
 0x135   : > { %v931_v32 = vpop.permute.xlu1 %930  ;;  %v929_v19 = vpop.permute.xlu0 %928 }
 0x136   : > { %v3909_v2 = vsel %vm1714_vm4, %v3707_v49, %v931_v32  ;;  %v3913_v56 = vsel %vm1714_vm4, %v3710_v26, %v929_v19  ;;  %v4897_v26 = vld [vmem:[#allocation11_spill] sm:$0xff]  ;;  %v4903_v19 = vld [vmem:[#allocation14_spill] sm:$0xff] }
 0x137   : > { %1204 = vrot.lane.b32.xlu1 %v4894_v48, %s3072_s6  ;;  %1172 = vrot.lane.b32.xlu0 %v4892_v5, %s3072_s6 }
 0x139   : > { %v935_v23 = vpop.permute.xlu1 %934  ;;  %v933_v27 = vpop.permute.xlu0 %932 }
 0x13a   : > { %v3921_v44 = vsel %vm1714_vm4, %v3723_v54, %v935_v23  ;;  %v3925_v49 = vsel %vm1714_vm4, %v3726_v53, %v933_v27 }
 0x13b   : > { %4895 = vst [vmem:[#allocation37_spill] sm:$0xff] %v3921_v44  ;;  %1586 = vrot.lane.b32.xlu1 %v4896_v41, %s3075_s9  ;;  %1554 = vrot.lane.b32.xlu0 %v4897_v26, %s3075_s9  ;;  %v4925_v44 = vld [vmem:[#allocation34_spill] sm:$0xff] }
 0x13d   : > { %v939_v36 = vpop.permute.xlu1 %938  ;;  %v937_v6 = vpop.permute.xlu0 %936 }
 0x13e   : > { %v3933_v11 = vsel %vm1714_vm4, %v3734_v28, %v939_v36  ;;  %v3937_v54 = vsel %vm1714_vm4, %v3738_v45, %v937_v6 }
 0x13f   : > { %4898 = vst [vmem:[#allocation38_spill] sm:$0xff] %v3933_v11  ;;  %4899 = vst [vmem:[#allocation16_spill] sm:$0xff] %v3937_v54  ;;  %1206 = vrot.lane.b32.xlu1 %v4896_v41, %s3072_s6  ;;  %1174 = vrot.lane.b32.xlu0 %v4897_v26, %s3072_s6 }
 0x141   : > { %v943_v53 = vpop.permute.xlu1 %942  ;;  %v941_v5 = vpop.permute.xlu0 %940 }
 0x142   : > { %v3945_v16 = vsel %vm1714_vm4, %v3746_v29, %v943_v53  ;;  %v3949_v28 = vsel %vm1714_vm4, %v3750_v0, %v941_v5  ;;  %v4910_v5 = vld [vmem:[#allocation19_spill] sm:$0xff] }
 0x143   : > { %4900 = vst [vmem:[#allocation10_spill] sm:$0xff] %v3945_v16  ;;  %4901 = vst [vmem:[#allocation39_spill] sm:$0xff] %v3949_v28  ;;  %1332 = vrot.lane.b32.xlu1 %v3610_v55, %s3073_s7  ;;  %1300 = vrot.lane.b32.xlu0 %v3506_v47, %s3073_s7 }
 0x145   : > { %v3955_v45 = vpop.permute.xlu1 %946  ;;  %v3957_v58 = vpop.permute.xlu0 %944 }
 0x147   : > { %1334 = vrot.lane.b32.xlu1 %v3607_v39, %s3073_s7  ;;  %1302 = vrot.lane.b32.xlu0 %v3503_v46, %s3073_s7 }
 0x149   : > { %v3963_v29 = vpop.permute.xlu1 %950  ;;  %v3965_v0 = vpop.permute.xlu0 %948 }
 0x14b   : > { %1460 = vrot.lane.b32.xlu1 %v4902_v62, %s3074_s8  ;;  %1428 = vrot.lane.b32.xlu0 %v3247_v8, %s3074_s8 }
 0x14d   : > { %v955_v55 = vpop.permute.xlu1 %954  ;;  %v953_v47 = vpop.permute.xlu0 %952 }
 0x14e   : > { %v3973_v48 = vsel %vm1714_vm4, %v3779_v59, %v955_v55  ;;  %v3977_v39 = vsel %vm1714_vm4, %v3782_v30, %v953_v47  ;;  %v4904_v30 = vld [vmem:[#allocation8_spill] sm:$0xff] }
 0x14f   : > { %1430 = vrot.lane.b32.xlu1 %v3244_v7, %s3074_s8  ;;  %1080 = vrot.lane.b32.xlu0 %v4902_v62, %s3071_s5 }
 0x151   : > { %v959_v46 = vpop.permute.xlu1 %958  ;;  %v957_v32 = vpop.permute.xlu0 %956 }
 0x152   : > { %v3985_v8 = vsel %vm1714_vm4, %v3795_v1, %v959_v46  ;;  %v3989_v59 = vsel %vm1714_vm4, %v3798_v3, %v957_v32  ;;  %v4905_v3 = vld [vmem:[#allocation20_spill] sm:$0xff]  ;;  %v2710_v32 = vld [vmem:[%s3177_s10 + $0x121] sm:$0xff] }
 0x153   : > { %1556 = vrot.lane.b32.xlu1 %v4903_v19, %s3075_s9  ;;  %1462 = vrot.lane.b32.xlu0 %v4904_v30, %s3074_s8 }
 0x155   : > { %v963_v7 = vpop.permute.xlu1 %962  ;;  %v961_v23 = vpop.permute.xlu0 %960 }
 0x156   : > { %v3997_v27 = vsel %vm1714_vm4, %v3811_v33, %v963_v7  ;;  %v4001_v1 = vsel %vm1714_vm4, %v3814_v34, %v961_v23 }
 0x157   : > { %1082 = vrot.lane.b32.xlu1 %v4904_v30, %s3071_s5  ;;  %1588 = vrot.lane.b32.xlu0 %v4905_v3, %s3075_s9 }
 0x159   : > { %v967_v41 = vpop.permute.xlu1 %966  ;;  %v965_v26 = vpop.permute.xlu0 %964 }
 0x15a   : > { %v4009_v36 = vsel %vm1714_vm4, %v3827_v35, %v967_v41  ;;  %v4013_v33 = vsel %vm1714_vm4, %v3830_v51, %v965_v26  ;;  %v4911_v51 = vld [vmem:[#allocation13_spill] sm:$0xff]  ;;  %v4914_v41 = vld [vmem:[#allocation15_spill] sm:$0xff] }
 0x15b   : > { %4906 = vst [vmem:[#allocation45_spill] sm:$0xff] %v4009_v36  ;;  %4907 = vst [vmem:[#allocation40_spill] sm:$0xff] %v4013_v33  ;;  %1208 = vrot.lane.b32.xlu1 %v4905_v3, %s3072_s6  ;;  %1176 = vrot.lane.b32.xlu0 %v4903_v19, %s3072_s6  ;;  %v2694_v19 = vld [vmem:[%s3177_s10 + $0x61] sm:$0xff] }
 0x15d   : > { %v971_v34 = vpop.permute.xlu1 %970  ;;  %v969_v6 = vpop.permute.xlu0 %968 }
 0x15e   : > { %v4021_v53 = vsel %vm1714_vm4, %v3843_v17, %v971_v34  ;;  %v4025_v35 = vsel %vm1714_vm4, %v3846_v18, %v969_v6  ;;  %v4916_v6 = vld [vmem:[#allocation22_spill] sm:$0xff] }
 0x15f   : > { %4908 = vst [vmem:[#allocation46_spill] sm:$0xff] %v4021_v53  ;;  %4909 = vst [vmem:[#allocation41_spill] sm:$0xff] %v4025_v35  ;;  %1590 = vrot.lane.b32.xlu1 %v4910_v5, %s3075_s9  ;;  %1558 = vrot.lane.b32.xlu0 %v4911_v51, %s3075_s9 }
 0x161   : > { %v975_v62 = vpop.permute.xlu1 %974  ;;  %v973_v55 = vpop.permute.xlu0 %972 }
 0x162   : > { %v4033_v47 = vsel %vm1714_vm4, %v3854_v20, %v975_v62  ;;  %v4037_v17 = vsel %vm1714_vm4, %v3858_v31, %v973_v55  ;;  %v2727_v55 = vld [vmem:[%s3177_s10 + $0x6a] sm:$0xff] }
 0x163   : > { %4912 = vst [vmem:[#allocation42_spill] sm:$0xff] %v4033_v47  ;;  %4913 = vst [vmem:[#allocation7_spill] sm:$0xff] %v4037_v17  ;;  %1210 = vrot.lane.b32.xlu1 %v4910_v5, %s3072_s6  ;;  %1178 = vrot.lane.b32.xlu0 %v4911_v51, %s3072_s6  ;;  %v2632_v5 = vld [vmem:[%s3177_s10 + $0x62] sm:$0xff] }
 0x165   : > { %v4043_v18 = vpop.permute.xlu1 %1042  ;;  %v4045_v46 = vpop.permute.xlu0 %1040 }
 0x167   : > { %1336 = vrot.lane.b32.xlu1 %v3624_v24, %s3073_s7  ;;  %1304 = vrot.lane.b32.xlu0 %v3518_v63, %s3073_s7  ;;  %v2695_v24 = vld [vmem:[%s3177_s10 + $0x69] sm:$0xff] }
 0x169   : > { %v4051_v20 = vpop.permute.xlu1 %1046  ;;  %v4053_v31 = vpop.permute.xlu0 %1044 }
 0x16b   : > { %1338 = vrot.lane.b32.xlu1 %v3621_v40, %s3073_s7  ;;  %1306 = vrot.lane.b32.xlu0 %v3515_v60, %s3073_s7  ;;  %v2711_v40 = vld [vmem:[%s3177_s10 + $0x129] sm:$0xff] }
 0x16d   : > { %v4061_v30 = vpop.permute.xlu1 %1050  ;;  %v4063_v7 = vpop.permute.xlu0 %1048 }
 0x16f   : > { %1464 = vrot.lane.b32.xlu1 %v2710_v32, %s3074_s8  ;;  %1432 = vrot.lane.b32.xlu0 %v2694_v19, %s3074_s8 }
 0x171   : > { %v4068_v63 = vpop.permute.xlu1 %1054  ;;  %v4070_v23 = vpop.permute.xlu0 %1052 }
 0x173   : > { %1434 = vrot.lane.b32.xlu1 %v2695_v24, %s3074_s8  ;;  %1084 = vrot.lane.b32.xlu0 %v2710_v32, %s3071_s5  ;;  %v4921_v24 = vld [vmem:[#allocation21_spill] sm:$0xff] }
 0x175   : > { %v4075_v60 = vpop.permute.xlu1 %1058  ;;  %v4077_v3 = vpop.permute.xlu0 %1056 }
 0x177   : > { %1560 = vrot.lane.b32.xlu1 %v4914_v41, %s3075_s9  ;;  %1466 = vrot.lane.b32.xlu0 %v2711_v40, %s3074_s8 }
 0x179   : > { %v4082_v26 = vpop.permute.xlu1 %1062  ;;  %v4084_v34 = vpop.permute.xlu0 %1060 }
 0x17a   : > { %4915 = vst [vmem:[#allocation12_spill] sm:$0xff] %v4082_v26 }
 0x17b   : > { %1086 = vrot.lane.b32.xlu1 %v2711_v40, %s3071_s5  ;;  %1592 = vrot.lane.b32.xlu0 %v4916_v6, %s3075_s9 }
 0x17d   : > { %v4090_v51 = vpop.permute.xlu1 %1066  ;;  %v4092_v62 = vpop.permute.xlu0 %1064 }
 0x17e   : > { %4917 = vst [vmem:[#allocation6_spill] sm:$0xff] %v4090_v51  ;;  %4918 = vst [vmem:[#allocation18_spill] sm:$0xff] %v4092_v62  ;;  %v4922_v51 = vld [vmem:[#allocation24_spill] sm:$0xff] }
 0x17f   : > { %1212 = vrot.lane.b32.xlu1 %v4916_v6, %s3072_s6  ;;  %1180 = vrot.lane.b32.xlu0 %v2632_v5, %s3072_s6 }
 0x181   : > { %v4098_v32 = vpop.permute.xlu1 %1070  ;;  %v4100_v19 = vpop.permute.xlu0 %1068 }
 0x182   : > { %4919 = vst [vmem:[#allocation17_spill] sm:$0xff] %v4098_v32  ;;  %4920 = vst [vmem:[#allocation11_spill] sm:$0xff] %v4100_v19  ;;  %v2713_v19 = vld [vmem:[%s3177_s10 + $0x141] sm:$0xff] }
 0x183   : > { %1594 = vrot.lane.b32.xlu1 %v4921_v24, %s3075_s9  ;;  %1562 = vrot.lane.b32.xlu0 %v2727_v55, %s3075_s9 }
 0x185   : > { %v4105_v40 = vpop.permute.xlu1 %1074  ;;  %v1073_v41 = vpop.permute.xlu0 %1072 }
 0x187   : > { %1214 = vrot.lane.b32.xlu1 %v4921_v24, %s3072_s6  ;;  %1182 = vrot.lane.b32.xlu0 %v2727_v55, %s3072_s6  ;;  %v2712_v55 = vld [vmem:[%s3177_s10 + $0x139] sm:$0xff] }
 0x188   : > { %v2696_v24 = vld [vmem:[%s3177_s10 + $0x79] sm:$0xff] }
 0x189   : > { %v1201_v6 = vpop.permute.xlu1 %1200  ;;  %v1169_v5 = vpop.permute.xlu0 %1168 }
 0x18b   : > { %1340 = vrot.lane.b32.xlu1 %v3636_v22, %s3073_s7  ;;  %1308 = vrot.lane.b32.xlu0 %v3536_v4, %s3073_s7  ;;  %v2697_v4 = vld [vmem:[%s3177_s10 + $0x81] sm:$0xff] }
 0x18d   : > { %v4114_v47 = vpop.permute.xlu1 %1202  ;;  %v4116_v16 = vpop.permute.xlu0 %1170 }
 0x18f   : > { %1342 = vrot.lane.b32.xlu1 %v3633_v38, %s3073_s7  ;;  %1310 = vrot.lane.b32.xlu0 %v3533_v61, %s3073_s7  ;;  %v334_v38 = vld [vmem:[%s3177_s10] sm:$0xff] }
 0x190   : > { %v2728_v61 = vld [vmem:[%s3177_s10 + $0x7a] sm:$0xff]  ;;  %v1649_v35 = vsel %vm1648_vm1, %v334_v38, %v4922_v51 }
 0x191   : > { %v1329_v32 = vpop.permute.xlu1 %1328  ;;  %v1297_v22 = vpop.permute.xlu0 %1296  ;;  %v4924_v38 = vld [vmem:[#allocation30_spill] sm:$0xff] }
 0x192   : > { %v1665_v26 = vsel %vm1648_vm1, %v4925_v44, %v4924_v38  ;;  %v4926_v38 = vld [vmem:[#allocation26_spill] sm:$0xff] }
 0x193   : > { %1468 = vrot.lane.b32.xlu1 %v2712_v55, %s3074_s8  ;;  %1436 = vrot.lane.b32.xlu0 %v2696_v24, %s3074_s8  ;;  %v4923_v24 = vld [vmem:[#allocation44_spill] sm:$0xff] }
 0x194   : > { %v1682_v54 = vsel %vm1681_vm2, %v1649_v35, %v4923_v24 }
 0x195   : > { %v4127_v17 = vpop.permute.xlu1 %1330  ;;  %v4129_v28 = vpop.permute.xlu0 %1298 }
 0x197   : > { %1438 = vrot.lane.b32.xlu1 %v2697_v4, %s3074_s8  ;;  %1088 = vrot.lane.b32.xlu0 %v2712_v55, %s3071_s5  ;;  %v2744_v4 = vld [vmem:[%s3177_s10 + $0x13a] sm:$0xff]  ;;  %v1715_v55 = vsel %vm1714_vm4, %v1682_v54, %v3866_v43  ;;  %v1698_v43 = vsel %vm1681_vm2, %v1665_v26, %v3758_v25  ;;  %v335_v25 = vld [vmem:[%s3177_s10 + $0x8] sm:$0xff] }
 0x198   : > { %v1748_v51 = vsel %vm1747_vm5, %v1715_v55, %v4045_v46  ;;  %v1731_v35 = vsel %vm1714_vm4, %v1698_v43, %v3957_v58  ;;  %v2745_v58 = vld [vmem:[%s3177_s10 + $0x142] sm:$0xff]  ;;  %v4928_v43 = vld [vmem:[#allocation33_spill] sm:$0xff] }
 0x199   : > { %v1457_v53 = vpop.permute.xlu1 %1456  ;;  %v1425_v11 = vpop.permute.xlu0 %1424  ;;  %v1781_v33 = vsel %vm1780_vm6, %v1748_v51, %v1169_v5 }
 0x19a   : > { %v1814_v54 = vsel %vm1813_vm7, %v1781_v33, %v1297_v22 }
 0x19b   : > { %1564 = vrot.lane.b32.xlu1 %v2728_v61, %s3075_s9  ;;  %1470 = vrot.lane.b32.xlu0 %v2713_v19, %s3074_s8  ;;  %v1847_v44 = vsel %vm1846_vm8, %v1814_v54, %v1425_v11  ;;  %v2729_v11 = vld [vmem:[%s3177_s10 + $0x82] sm:$0xff] }
 0x19d   : > { %v1427_v62 = vpop.permute.xlu1 %1426  ;;  %v4145_v36 = vpop.permute.xlu0 %1076 }
 0x19f   : > { %1090 = vrot.lane.b32.xlu1 %v2713_v19, %s3071_s5  ;;  %1596 = vrot.lane.b32.xlu0 %v2744_v4, %s3075_s9  ;;  %v1764_v19 = vsel %vm1747_vm5, %v1731_v35, %v1073_v41 }
 0x1a0   : > { %v1797_v55 = vsel %vm1780_vm6, %v1764_v19, %v1201_v6  ;;  %v1650_v6 = vsel %vm1648_vm1, %v335_v25, %v4926_v38 }
 0x1a1   : > { %v1553_v46 = vpop.permute.xlu1 %1552  ;;  %v1459_v5 = vpop.permute.xlu0 %1458  ;;  %v1830_v33 = vsel %vm1813_vm7, %v1797_v55, %v1329_v32  ;;  %v4929_v32 = vld [vmem:[#allocation43_spill] sm:$0xff] }
 0x1a2   : > { %v1880_v24 = vsel %vm1879_vm9, %v1847_v44, %v1553_v46  ;;  %v1863_v26 = vsel %vm1846_vm8, %v1830_v33, %v1457_v53  ;;  %v1683_v53 = vsel %vm1681_vm2, %v1650_v6, %v4929_v32  ;;  %v4930_v32 = vld [vmem:[#allocation23_spill] sm:$0xff] }
 0x1a3   : > { %1216 = vrot.lane.b32.xlu1 %v2744_v4, %s3072_s6  ;;  %1184 = vrot.lane.b32.xlu0 %v2728_v61, %s3072_s6  ;;  %v4927_v4 = vld [vmem:[#allocation29_spill] sm:$0xff]  ;;  %v1716_v35 = vsel %vm1714_vm4, %v1683_v53, %v3864_v42  ;;  %v4931_v53 = vld [vmem:[#allocation27_spill] sm:$0xff] }
 0x1a4   : > { %2836 = vmatprep.mubr.msk.f32.mxu0 %vm1915_vm10, %v1880_v24  ;;  %v1666_v61 = vsel %vm1648_vm1, %v4928_v43, %v4927_v4  ;;  %v1749_v24 = vsel %vm1747_vm5, %v1716_v35, %v4043_v18  ;;  %v2666_v18 = vld [vmem:[%s3177_s10 + $0x90] sm:$0xff] }
 0x1a5   : > { %v4172_v22 = vpop.permute.xlu1 %1078  ;;  %v1585_v41 = vpop.permute.xlu0 %1584  ;;  %v1699_v54 = vsel %vm1681_vm2, %v1666_v61, %v3756_v9  ;;  %v1782_v25 = vsel %vm1780_vm6, %v1749_v24, %v4116_v16  ;;  %v2730_v4 = vld [vmem:[%s3177_s10 + $0x92] sm:$0xff] }
 0x1a6   : > { %v1896_v51 = vsel %vm1879_vm9, %v1863_v26, %v1585_v41  ;;  %v1732_v44 = vsel %vm1714_vm4, %v1699_v54, %v3955_v45  ;;  %v1815_v45 = vsel %vm1813_vm7, %v1782_v25, %v4129_v28  ;;  %v2667_v28 = vld [vmem:[%s3177_s10 + $0x98] sm:$0xff]  ;;  %v1651_v54 = vsel %vm1648_vm1, %v4931_v53, %v4930_v32  ;;  %v4932_v35 = vld [vmem:[#allocation48_spill] sm:$0xff]  ;;  %v4937_v53 = vld [vmem:[#allocation31_spill] sm:$0xff] }
 0x1a7   : > { %1598 = vrot.lane.b32.xlu1 %v2745_v58, %s3075_s9  ;;  %1566 = vrot.lane.b32.xlu0 %v2729_v11, %s3075_s9  ;;  %v1765_v55 = vsel %vm1747_vm5, %v1732_v44, %v4105_v40  ;;  %v1848_v40 = vsel %vm1846_vm8, %v1815_v45, %v1427_v62  ;;  %v1684_v44 = vsel %vm1681_vm2, %v1651_v54, %v4932_v35  ;;  %v2746_v24 = vld [vmem:[%s3177_s10 + $0x152] sm:$0xff]  ;;  %v4938_v54 = vld [vmem:[#allocation35_spill] sm:$0xff] }
 0x1a8   : > { %2860 = vmatprep.mubr.msk.f32.mxu1 %vm1915_vm10, %v1896_v51  ;;  %v1798_v9 = vsel %vm1780_vm6, %v1765_v55, %v4114_v47  ;;  %v2699_v51 = vld [vmem:[%s3177_s10 + $0x99] sm:$0xff]  ;;  %v1717_v55 = vsel %vm1714_vm4, %v1684_v44, %v3875_v57  ;;  %v4933_v45 = vld [vmem:[#allocation32_spill] sm:$0xff] }
 0x1a9   : > { %v4191_v46 = vpop.permute.xlu1 %1204  ;;  %v1173_v19 = vpop.permute.xlu0 %1172  ;;  %v1831_v42 = vsel %vm1813_vm7, %v1798_v9, %v4127_v17  ;;  %v4936_v32 = vld [vmem:[#allocation28_spill] sm:$0xff] }
 0x1aa   : > { %v1864_v47 = vsel %vm1846_vm8, %v1831_v42, %v1459_v5  ;;  %v2714_v5 = vld [vmem:[%s3177_s10 + $0x151] sm:$0xff]  ;;  %v1750_v42 = vsel %vm1747_vm5, %v1717_v55, %v4053_v31 }
 0x1ab   : > { %1218 = vrot.lane.b32.xlu1 %v2745_v58, %s3072_s6  ;;  %1186 = vrot.lane.b32.xlu0 %v2729_v11, %s3072_s6 }
 0x1ad   : > { %v1587_v33 = vpop.permute.xlu1 %1586  ;;  %v1555_v16 = vpop.permute.xlu0 %1554 }
 0x1ae   : > { %v1897_v26 = vsel %vm1879_vm9, %v1864_v47, %v1587_v33  ;;  %v1881_v58 = vsel %vm1879_vm9, %v1848_v40, %v1555_v16  ;;  %v1783_v47 = vsel %vm1780_vm6, %v1750_v42, %v1173_v19 }
 0x1af   : > { %1344 = vrot.lane.b32.xlu1 %v4888_v15, %s3073_s7  ;;  %1312 = vrot.lane.b32.xlu0 %v2666_v18, %s3073_s7  ;;  %v2698_v15 = vld [vmem:[%s3177_s10 + $0x91] sm:$0xff] }
 0x1b0   : > { %2837 = vmatmul.mubr.msk.f32.vlgmr.msra.gmra.mxu0 %vm1915_vm10, %v1881_v58  ;;  %2861 = vmatmul.mubr.msk.f32.vlgmr.msra.gmra.mxu1 %vm1915_vm10, %v1897_v26  ;;  %v4934_v18 = vld [vmem:[#allocation36_spill] sm:$0xff] }
 0x1b1   : > { %v4218_v17 = vpop.permute.xlu1 %1206  ;;  %v4220_v62 = vpop.permute.xlu0 %1174  ;;  %v1667_v40 = vsel %vm1648_vm1, %v4934_v18, %v4933_v45 }
 0x1b2   : > { %v1700_v57 = vsel %vm1681_vm2, %v1667_v40, %v3766_v50 }
 0x1b3   : > { %1346 = vrot.lane.b32.xlu1 %v4886_v12, %s3073_s7  ;;  %1314 = vrot.lane.b32.xlu0 %v2667_v28, %s3073_s7  ;;  %v2715_v12 = vld [vmem:[%s3177_s10 + $0x159] sm:$0xff]  ;;  %v1733_v31 = vsel %vm1714_vm4, %v1700_v57, %v3965_v0 }
 0x1b4   : > { %v1766_v19 = vsel %vm1747_vm5, %v1733_v31, %v4145_v36  ;;  %v2747_v0 = vld [vmem:[%s3177_s10 + $0x15a] sm:$0xff] }
 0x1b5   : > { %v1333_v11 = vpop.permute.xlu1 %1332  ;;  %v1301_v41 = vpop.permute.xlu0 %1300 }
 0x1b6   : > { %v1816_v33 = vsel %vm1813_vm7, %v1783_v47, %v1301_v41  ;;  %v2668_v47 = vld [vmem:[%s3177_s10 + $0xa8] sm:$0xff] }
 0x1b7   : > { %1472 = vrot.lane.b32.xlu1 %v2714_v5, %s3074_s8  ;;  %1440 = vrot.lane.b32.xlu0 %v2698_v15, %s3074_s8  ;;  %v2731_v15 = vld [vmem:[%s3177_s10 + $0x9a] sm:$0xff] }
 0x1b9   : > { %v1335_v38 = vpop.permute.xlu1 %1334  ;;  %v1303_v6 = vpop.permute.xlu0 %1302 }
 0x1bb   : > { %1442 = vrot.lane.b32.xlu1 %v2699_v51, %s3074_s8  ;;  %1092 = vrot.lane.b32.xlu0 %v2714_v5, %s3071_s5  ;;  %v1799_v5 = vsel %vm1780_vm6, %v1766_v19, %v4191_v46 }
 0x1bc   : > { %v1832_v50 = vsel %vm1813_vm7, %v1799_v5, %v1333_v11  ;;  %v4939_v11 = vld [vmem:[#allocation47_spill] sm:$0xff]  ;;  %v2701_v5 = vld [vmem:[%s3177_s10 + $0xb1] sm:$0xff] }
 0x1bd   : > { %v1461_v43 = vpop.permute.xlu1 %1460  ;;  %v1429_v61 = vpop.permute.xlu0 %1428 }
 0x1be   : > { %v1849_v16 = vsel %vm1846_vm8, %v1816_v33, %v1429_v61  ;;  %v1865_v41 = vsel %vm1846_vm8, %v1832_v50, %v1461_v43  ;;  %v4935_v61 = vld [vmem:[#allocation25_spill] sm:$0xff] }
 0x1bf   : > { %1568 = vrot.lane.b32.xlu1 %v2730_v4, %s3075_s9  ;;  %1474 = vrot.lane.b32.xlu0 %v2715_v12, %s3074_s8  ;;  %v1652_v46 = vsel %vm1648_vm1, %v4936_v32, %v4935_v61  ;;  %v2748_v61 = vld [vmem:[%s3177_s10 + $0x16a] sm:$0xff] }
 0x1c0   : > { %v1685_v43 = vsel %vm1681_vm2, %v1652_v46, %v4939_v11 }
 0x1c1   : > { %v1431_v9 = vpop.permute.xlu1 %1430  ;;  %v4244_v25 = vpop.permute.xlu0 %1080  ;;  %v1718_v44 = vsel %vm1714_vm4, %v1685_v43, %v3873_v52 }
 0x1c2   : > { %v1751_v45 = vsel %vm1747_vm5, %v1718_v44, %v4051_v20  ;;  %v2684_v20 = vld [vmem:[%s3177_s10 + $0x168] sm:$0xff]  ;;  %v1768_v44 = vsel %vm1747_vm5, %v3977_v39, %v4244_v25 }
 0x1c3   : > { %1094 = vrot.lane.b32.xlu1 %v2715_v12, %s3071_s5  ;;  %1600 = vrot.lane.b32.xlu0 %v2746_v24, %s3075_s9 }
 0x1c5   : > { %v1557_v26 = vpop.permute.xlu1 %1556  ;;  %v1463_v58 = vpop.permute.xlu0 %1462 }
 0x1c6   : > { %v1882_v28 = vsel %vm1879_vm9, %v1849_v16, %v1557_v26  ;;  %v2716_v26 = vld [vmem:[%s3177_s10 + $0x169] sm:$0xff] }
 0x1c7   : > { %1220 = vrot.lane.b32.xlu1 %v2746_v24, %s3072_s6  ;;  %1188 = vrot.lane.b32.xlu0 %v2730_v4, %s3072_s6  ;;  %v1668_v4 = vsel %vm1648_vm1, %v4938_v54, %v4937_v53  ;;  %v1752_v53 = vsel %vm1747_vm5, %v3889_v14, %v4063_v7 }
 0x1c8   : > { %2839 = vmatprep.mubr.msk.f32.mxu0 %vm1915_vm10, %v1882_v28  ;;  %v1701_v35 = vsel %vm1681_vm2, %v1668_v4, %v3764_v10  ;;  %v1784_v10 = vsel %vm1780_vm6, %v1751_v45, %v4220_v62  ;;  %v2733_v45 = vld [vmem:[%s3177_s10 + $0xb2] sm:$0xff] }
 0x1c9   : > { %v4272_v51 = vpop.permute.xlu1 %1082  ;;  %v1589_v36 = vpop.permute.xlu0 %1588  ;;  %v1734_v24 = vsel %vm1714_vm4, %v1701_v35, %v3963_v29  ;;  %v1817_v29 = vsel %vm1813_vm7, %v1784_v10, %v1303_v6  ;;  %v2669_v6 = vld [vmem:[%s3177_s10 + $0xb0] sm:$0xff] }
 0x1ca   : > { %v1898_v12 = vsel %vm1879_vm9, %v1865_v41, %v1589_v36  ;;  %v1767_v18 = vsel %vm1747_vm5, %v1734_v24, %v4172_v22  ;;  %v1850_v22 = vsel %vm1846_vm8, %v1817_v29, %v1431_v9  ;;  %v2717_v41 = vld [vmem:[%s3177_s10 + $0x171] sm:$0xff]  ;;  %v1769_v29 = vsel %vm1747_vm5, %v3973_v48, %v4272_v51 }
 0x1cb   : > { %1602 = vrot.lane.b32.xlu1 %v2747_v0, %s3075_s9  ;;  %1570 = vrot.lane.b32.xlu0 %v2731_v15, %s3075_s9  ;;  %v1800_v40 = vsel %vm1780_vm6, %v1767_v18, %v4218_v17 }
 0x1cc   : > { %2863 = vmatprep.mubr.msk.f32.mxu1 %vm1915_vm10, %v1898_v12  ;;  %v1833_v52 = vsel %vm1813_vm7, %v1800_v40, %v1335_v38  ;;  %v2685_v38 = vld [vmem:[%s3177_s10 + $0x170] sm:$0xff] }
 0x1cd   : > { %v1209_v55 = vpop.permute.xlu1 %1208  ;;  %v1177_v42 = vpop.permute.xlu0 %1176  ;;  %v1866_v17 = vsel %vm1846_vm8, %v1833_v52, %v1463_v58  ;;  %v2700_v58 = vld [vmem:[%s3177_s10 + $0xa9] sm:$0xff]  ;;  %v1753_v52 = vsel %vm1747_vm5, %v3885_v13, %v4061_v30  ;;  %v2670_v13 = vld [vmem:[%s3177_s10 + $0xc0] sm:$0xff] }
 0x1ce   : > { %v1785_v54 = vsel %vm1780_vm6, %v1752_v53, %v1177_v42  ;;  %v1801_v14 = vsel %vm1780_vm6, %v1768_v44, %v1209_v55  ;;  %v2749_v42 = vld [vmem:[%s3177_s10 + $0x172] sm:$0xff] }
 0x1cf   : > { %1222 = vrot.lane.b32.xlu1 %v2747_v0, %s3072_s6  ;;  %1190 = vrot.lane.b32.xlu0 %v2731_v15, %s3072_s6  ;;  %v2732_v15 = vld [vmem:[%s3177_s10 + $0xaa] sm:$0xff] }
 0x1d1   : > { %v1591_v57 = vpop.permute.xlu1 %1590  ;;  %v1559_v62 = vpop.permute.xlu0 %1558 }
 0x1d2   : > { %v1899_v33 = vsel %vm1879_vm9, %v1866_v17, %v1591_v57  ;;  %v1883_v31 = vsel %vm1879_vm9, %v1850_v22, %v1559_v62  ;;  %v2686_v57 = vld [vmem:[%s3177_s10 + $0x180] sm:$0xff] }
 0x1d3   : > { %1348 = vrot.lane.b32.xlu1 %v2684_v20, %s3073_s7  ;;  %1316 = vrot.lane.b32.xlu0 %v2668_v47, %s3073_s7 }
 0x1d4   : > { %2840 = vmatmul.mubr.msk.f32.gmra.mxu0 %vm1915_vm10, %v1883_v31  ;;  %2864 = vmatmul.mubr.msk.f32.gmra.mxu1 %vm1915_vm10, %v1899_v33 }
 0x1d5   : > { %v1211_v9 = vpop.permute.xlu1 %1210  ;;  %v1179_v16 = vpop.permute.xlu0 %1178 }
 0x1d6   : > { %v1802_v20 = vsel %vm1780_vm6, %v1769_v29, %v1211_v9  ;;  %v1786_v47 = vsel %vm1780_vm6, %v1753_v52, %v1179_v16 }
 0x1d7   : > { %1350 = vrot.lane.b32.xlu1 %v2685_v38, %s3073_s7  ;;  %1318 = vrot.lane.b32.xlu0 %v2669_v6, %s3073_s7  ;;  %v2687_v38 = vld [vmem:[%s3177_s10 + $0x188] sm:$0xff] }
 0x1d8   : > { %v2671_v6 = vld [vmem:[%s3177_s10 + $0xc8] sm:$0xff] }
 0x1d9   : > { %v1337_v19 = vpop.permute.xlu1 %1336  ;;  %v1305_v28 = vpop.permute.xlu0 %1304 }
 0x1da   : > { %v1818_v4 = vsel %vm1813_vm7, %v1785_v54, %v1305_v28  ;;  %v1834_v7 = vsel %vm1813_vm7, %v1801_v14, %v1337_v19  ;;  %v1754_v54 = vsel %vm1747_vm5, %v3901_v37, %v4070_v23 }
 0x1db   : > { %1476 = vrot.lane.b32.xlu1 %v2716_v26, %s3074_s8  ;;  %1444 = vrot.lane.b32.xlu0 %v2700_v58, %s3074_s8  ;;  %v2702_v58 = vld [vmem:[%s3177_s10 + $0xc1] sm:$0xff] }
 0x1dd   : > { %v1339_v50 = vpop.permute.xlu1 %1338  ;;  %v1307_v0 = vpop.permute.xlu0 %1306 }
 0x1de   : > { %v1835_v22 = vsel %vm1813_vm7, %v1802_v20, %v1339_v50  ;;  %v1819_v17 = vsel %vm1813_vm7, %v1786_v47, %v1307_v0 }
 0x1df   : > { %1446 = vrot.lane.b32.xlu1 %v2701_v5, %s3074_s8  ;;  %1096 = vrot.lane.b32.xlu0 %v2716_v26, %s3071_s5  ;;  %v2718_v26 = vld [vmem:[%s3177_s10 + $0x181] sm:$0xff]  ;;  %v2703_v5 = vld [vmem:[%s3177_s10 + $0xc9] sm:$0xff] }
 0x1e1   : > { %v1465_v36 = vpop.permute.xlu1 %1464  ;;  %v1433_v12 = vpop.permute.xlu0 %1432 }
 0x1e2   : > { %v1851_v11 = vsel %vm1846_vm8, %v1818_v4, %v1433_v12  ;;  %v1867_v18 = vsel %vm1846_vm8, %v1834_v7, %v1465_v36  ;;  %v2751_v7 = vld [vmem:[%s3177_s10 + $0x18a] sm:$0xff] }
 0x1e3   : > { %1572 = vrot.lane.b32.xlu1 %v2732_v15, %s3075_s9  ;;  %1478 = vrot.lane.b32.xlu0 %v2717_v41, %s3074_s8 }
 0x1e5   : > { %v1435_v32 = vpop.permute.xlu1 %1434  ;;  %v4330_v46 = vpop.permute.xlu0 %1084 }
 0x1e6   : > { %v1852_v30 = vsel %vm1846_vm8, %v1819_v17, %v1435_v32 }
 0x1e7   : > { %1098 = vrot.lane.b32.xlu1 %v2717_v41, %s3071_s5  ;;  %1604 = vrot.lane.b32.xlu0 %v2748_v61, %s3075_s9  ;;  %v2719_v41 = vld [vmem:[%s3177_s10 + $0x189] sm:$0xff] }
 0x1e9   : > { %v1561_v43 = vpop.permute.xlu1 %1560  ;;  %v1467_v35 = vpop.permute.xlu0 %1466 }
 0x1ea   : > { %v1884_v24 = vsel %vm1879_vm9, %v1851_v11, %v1561_v43  ;;  %v1868_v48 = vsel %vm1846_vm8, %v1835_v22, %v1467_v35  ;;  %v2688_v22 = vld [vmem:[%s3177_s10 + $0x198] sm:$0xff] }
 0x1eb   : > { %1224 = vrot.lane.b32.xlu1 %v2748_v61, %s3072_s6  ;;  %1192 = vrot.lane.b32.xlu0 %v2732_v15, %s3072_s6  ;;  %v2734_v15 = vld [vmem:[%s3177_s10 + $0xc2] sm:$0xff] }
 0x1ec   : > { %2842 = vmatprep.mubr.msk.f32.mxu0 %vm1915_vm10, %v1884_v24  ;;  %v2750_v61 = vld [vmem:[%s3177_s10 + $0x182] sm:$0xff]  ;;  %v1770_v24 = vsel %vm1747_vm5, %v3989_v59, %v4330_v46 }
 0x1ed   : > { %v4352_v40 = vpop.permute.xlu1 %1086  ;;  %v1593_v39 = vpop.permute.xlu0 %1592 }
 0x1ee   : > { %v1900_v25 = vsel %vm1879_vm9, %v1867_v18, %v1593_v39 }
 0x1ef   : > { %1606 = vrot.lane.b32.xlu1 %v2749_v42, %s3075_s9  ;;  %1574 = vrot.lane.b32.xlu0 %v2733_v45, %s3075_s9 }
 0x1f0   : > { %2866 = vmatprep.mubr.msk.f32.mxu1 %vm1915_vm10, %v1900_v25 }
 0x1f1   : > { %v1213_v55 = vpop.permute.xlu1 %1212  ;;  %v1181_v10 = vpop.permute.xlu0 %1180 }
 0x1f2   : > { %v1787_v4 = vsel %vm1780_vm6, %v1754_v54, %v1181_v10  ;;  %v1803_v37 = vsel %vm1780_vm6, %v1770_v24, %v1213_v55  ;;  %v1755_v55 = vsel %vm1747_vm5, %v3897_v21, %v4068_v63  ;;  %v1771_v10 = vsel %vm1747_vm5, %v3985_v8, %v4352_v40  ;;  %v2672_v21 = vld [vmem:[%s3177_s10 + $0xd8] sm:$0xff] }
 0x1f3   : > { %1226 = vrot.lane.b32.xlu1 %v2749_v42, %s3072_s6  ;;  %1194 = vrot.lane.b32.xlu0 %v2733_v45, %s3072_s6  ;;  %v2735_v42 = vld [vmem:[%s3177_s10 + $0xca] sm:$0xff] }
 0x1f5   : > { %v1595_v51 = vpop.permute.xlu1 %1594  ;;  %v1563_v62 = vpop.permute.xlu0 %1562 }
 0x1f6   : > { %v1901_v33 = vsel %vm1879_vm9, %v1868_v48, %v1595_v51  ;;  %v1885_v31 = vsel %vm1879_vm9, %v1852_v30, %v1563_v62  ;;  %v2689_v30 = vld [vmem:[%s3177_s10 + $0x1a0] sm:$0xff] }
 0x1f7   : > { %1352 = vrot.lane.b32.xlu1 %v2686_v57, %s3073_s7  ;;  %1320 = vrot.lane.b32.xlu0 %v2670_v13, %s3073_s7  ;;  %v2673_v48 = vld [vmem:[%s3177_s10 + $0xe0] sm:$0xff] }
 0x1f8   : > { %2843 = vmatmul.mubr.msk.f32.gmra.mxu0 %vm1915_vm10, %v1885_v31  ;;  %2867 = vmatmul.mubr.msk.f32.gmra.mxu1 %vm1915_vm10, %v1901_v33  ;;  %v2720_v33 = vld [vmem:[%s3177_s10 + $0x199] sm:$0xff] }
 0x1f9   : > { %v1215_v9 = vpop.permute.xlu1 %1214  ;;  %v1183_v16 = vpop.permute.xlu0 %1182  ;;  %v2704_v31 = vld [vmem:[%s3177_s10 + $0xd9] sm:$0xff] }
 0x1fa   : > { %v1804_v52 = vsel %vm1780_vm6, %v1771_v10, %v1215_v9  ;;  %v1788_v29 = vsel %vm1780_vm6, %v1755_v55, %v1183_v16  ;;  %v2721_v9 = vld [vmem:[%s3177_s10 + $0x1a1] sm:$0xff] }
 0x1fb   : > { %1354 = vrot.lane.b32.xlu1 %v2687_v38, %s3073_s7  ;;  %1322 = vrot.lane.b32.xlu0 %v2671_v6, %s3073_s7  ;;  %v2705_v16 = vld [vmem:[%s3177_s10 + $0xe1] sm:$0xff] }
 0x1fd   : > { %v1341_v19 = vpop.permute.xlu1 %1340  ;;  %v1309_v28 = vpop.permute.xlu0 %1308 }
 0x1fe   : > { %v1820_v11 = vsel %vm1813_vm7, %v1787_v4, %v1309_v28  ;;  %v1836_v23 = vsel %vm1813_vm7, %v1803_v37, %v1341_v19  ;;  %v2752_v19 = vld [vmem:[%s3177_s10 + $0x19a] sm:$0xff] }
 0x1ff   : > { %1480 = vrot.lane.b32.xlu1 %v2718_v26, %s3074_s8  ;;  %1448 = vrot.lane.b32.xlu0 %v2702_v58, %s3074_s8  ;;  %v2736_v28 = vld [vmem:[%s3177_s10 + $0xda] sm:$0xff] }
 0x201   : > { %v1343_v50 = vpop.permute.xlu1 %1342  ;;  %v1311_v0 = vpop.permute.xlu0 %1310 }
 0x202   : > { %v1837_v20 = vsel %vm1813_vm7, %v1804_v52, %v1343_v50  ;;  %v1821_v47 = vsel %vm1813_vm7, %v1788_v29, %v1311_v0  ;;  %v2753_v0 = vld [vmem:[%s3177_s10 + $0x1a2] sm:$0xff] }
 0x203   : > { %1450 = vrot.lane.b32.xlu1 %v2703_v5, %s3074_s8  ;;  %1100 = vrot.lane.b32.xlu0 %v2718_v26, %s3071_s5 }
 0x205   : > { %v1469_v36 = vpop.permute.xlu1 %1468  ;;  %v1437_v12 = vpop.permute.xlu0 %1436 }
 0x206   : > { %v1853_v43 = vsel %vm1846_vm8, %v1820_v11, %v1437_v12  ;;  %v1869_v45 = vsel %vm1846_vm8, %v1836_v23, %v1469_v36  ;;  %v1756_v12 = vsel %vm1747_vm5, %v3913_v56, %v4077_v3 }
 0x207   : > { %1576 = vrot.lane.b32.xlu1 %v2734_v15, %s3075_s9  ;;  %1482 = vrot.lane.b32.xlu0 %v2719_v41, %s3074_s8 }
 0x209   : > { %v1439_v32 = vpop.permute.xlu1 %1438  ;;  %v4396_v53 = vpop.permute.xlu0 %1088 }
 0x20a   : > { %v1854_v63 = vsel %vm1846_vm8, %v1821_v47, %v1439_v32 }
 0x20b   : > { %1102 = vrot.lane.b32.xlu1 %v2719_v41, %s3071_s5  ;;  %1608 = vrot.lane.b32.xlu0 %v2750_v61, %s3075_s9 }
 0x20d   : > { %v1565_v35 = vpop.permute.xlu1 %1564  ;;  %v1471_v44 = vpop.permute.xlu0 %1470 }
 0x20e   : > { %v1886_v14 = vsel %vm1879_vm9, %v1853_v43, %v1565_v35  ;;  %v1870_v8 = vsel %vm1846_vm8, %v1837_v20, %v1471_v44  ;;  %v1772_v43 = vsel %vm1747_vm5, %v4001_v1, %v4396_v53  ;;  %v1757_v1 = vsel %vm1747_vm5, %v3909_v2, %v4075_v60 }
 0x20f   : > { %1228 = vrot.lane.b32.xlu1 %v2750_v61, %s3072_s6  ;;  %1196 = vrot.lane.b32.xlu0 %v2734_v15, %s3072_s6  ;;  %v2737_v15 = vld [vmem:[%s3177_s10 + $0xe2] sm:$0xff] }
 0x210   : > { %2845 = vmatprep.mubr.msk.f32.mxu0 %vm1915_vm10, %v1886_v14 }
 0x211   : > { %v4418_v18 = vpop.permute.xlu1 %1090  ;;  %v1597_v59 = vpop.permute.xlu0 %1596 }
 0x212   : > { %v1902_v46 = vsel %vm1879_vm9, %v1869_v45, %v1597_v59  ;;  %v1773_v53 = vsel %vm1747_vm5, %v3997_v27, %v4418_v18 }
 0x213   : > { %1610 = vrot.lane.b32.xlu1 %v2751_v7, %s3075_s9  ;;  %1578 = vrot.lane.b32.xlu0 %v2735_v42, %s3075_s9 }
 0x214   : > { %2869 = vmatprep.mubr.msk.f32.mxu1 %vm1915_vm10, %v1902_v46 }
 0x215   : > { %v1217_v39 = vpop.permute.xlu1 %1216  ;;  %v1185_v25 = vpop.permute.xlu0 %1184 }
 0x216   : > { %v1789_v61 = vsel %vm1780_vm6, %v1756_v12, %v1185_v25  ;;  %v1805_v56 = vsel %vm1780_vm6, %v1772_v43, %v1217_v39 }
 0x217   : > { %1230 = vrot.lane.b32.xlu1 %v2751_v7, %s3072_s6  ;;  %1198 = vrot.lane.b32.xlu0 %v2735_v42, %s3072_s6 }
 0x219   : > { %v1599_v40 = vpop.permute.xlu1 %1598  ;;  %v1567_v17 = vpop.permute.xlu0 %1566 }
 0x21a   : > { %v1903_v57 = vsel %vm1879_vm9, %v1870_v8, %v1599_v40  ;;  %v1887_v13 = vsel %vm1879_vm9, %v1854_v63, %v1567_v17  ;;  %v1758_v40 = vsel %vm1747_vm5, %v3925_v49, %v4084_v34 }
 0x21b   : > { %1356 = vrot.lane.b32.xlu1 %v2688_v22, %s3073_s7  ;;  %1324 = vrot.lane.b32.xlu0 %v2672_v21, %s3073_s7 }
 0x21c   : > { %2846 = vmatmul.mubr.msk.f32.gmra.mxu0 %vm1915_vm10, %v1887_v13  ;;  %2870 = vmatmul.mubr.msk.f32.gmra.mxu1 %vm1915_vm10, %v1903_v57 }
 0x21d   : > { %v1219_v51 = vpop.permute.xlu1 %1218  ;;  %v1187_v62 = vpop.permute.xlu0 %1186 }
 0x21e   : > { %v1806_v42 = vsel %vm1780_vm6, %v1773_v53, %v1219_v51  ;;  %v1790_v45 = vsel %vm1780_vm6, %v1757_v1, %v1187_v62  ;;  %v4940_v51 = vld [vmem:[#allocation40_spill] sm:$0xff]  ;;  %v302_v1 = vld [vmem:[#allocation2] sm:$0xff] }
 0x21f   : > { %1358 = vrot.lane.b32.xlu1 %v2689_v30, %s3073_s7  ;;  %1326 = vrot.lane.b32.xlu0 %v2673_v48, %s3073_s7  ;;  %v318_v53 = vld [vmem:[#allocation2 + $0x80] sm:$0xff] }
 0x221   : > { %v1345_v38 = vpop.permute.xlu1 %1344  ;;  %v1313_v6 = vpop.permute.xlu0 %1312 }
 0x222   : > { %v1822_v32 = vsel %vm1813_vm7, %v1789_v61, %v1313_v6  ;;  %v1838_v3 = vsel %vm1813_vm7, %v1805_v56, %v1345_v38 }
 0x223   : > { %1484 = vrot.lane.b32.xlu1 %v2720_v33, %s3074_s8  ;;  %1452 = vrot.lane.b32.xlu0 %v2704_v31, %s3074_s8 }
 0x225   : > { %v1347_v26 = vpop.permute.xlu1 %1346  ;;  %v1315_v58 = vpop.permute.xlu0 %1314 }
 0x226   : > { %v1839_v59 = vsel %vm1813_vm7, %v1806_v42, %v1347_v26  ;;  %v1823_v46 = vsel %vm1813_vm7, %v1790_v45, %v1315_v58  ;;  %v4941_v58 = vld [vmem:[#allocation12_spill] sm:$0xff] }
 0x227   : > { %1486 = vrot.lane.b32.xlu1 %v2721_v9, %s3074_s8  ;;  %1454 = vrot.lane.b32.xlu0 %v2705_v16, %s3074_s8 }
 0x229   : > { %v1473_v5 = vpop.permute.xlu1 %1472  ;;  %v1441_v50 = vpop.permute.xlu0 %1440 }
 0x22a   : > { %v1855_v54 = vsel %vm1846_vm8, %v1822_v32, %v1441_v50  ;;  %v1871_v44 = vsel %vm1846_vm8, %v1838_v3, %v1473_v5  ;;  %v4943_v5 = vld [vmem:[#allocation45_spill] sm:$0xff] }
 0x22b   : > { %1612 = vrot.lane.b32.xlu1 %v2752_v19, %s3075_s9  ;;  %1580 = vrot.lane.b32.xlu0 %v2736_v28, %s3075_s9  ;;  %v4942_v19 = vld [vmem:[#allocation37_spill] sm:$0xff] }
 0x22c   : > { %v1759_v28 = vsel %vm1747_vm5, %v4942_v19, %v4941_v58 }
 0x22d   : > { %v1443_v41 = vpop.permute.xlu1 %1442  ;;  %v1093_v36 = vpop.permute.xlu0 %1092 }
 0x22e   : > { %v1856_v39 = vsel %vm1846_vm8, %v1823_v46, %v1443_v41  ;;  %v1774_v62 = vsel %vm1747_vm5, %v4940_v51, %v1093_v36 }
 0x22f   : > { %1614 = vrot.lane.b32.xlu1 %v2753_v0, %s3075_s9  ;;  %1582 = vrot.lane.b32.xlu0 %v2737_v15, %s3075_s9 }
 0x231   : > { %v1569_v4 = vpop.permute.xlu1 %1568  ;;  %v1475_v11 = vpop.permute.xlu0 %1474 }
 0x232   : > { %v1888_v35 = vsel %vm1879_vm9, %v1855_v54, %v1569_v4  ;;  %v1872_v25 = vsel %vm1846_vm8, %v1839_v59, %v1475_v11 }
 0x233   : > { %2848 = vmatprep.mubr.msk.f32.mxu0 %vm1915_vm10, %v1888_v35 }
 0x235   : > { %v1095_v24 = vpop.permute.xlu1 %1094  ;;  %v1601_v14 = vpop.permute.xlu0 %1600 }
 0x236   : > { %v1904_v37 = vsel %vm1879_vm9, %v1871_v44, %v1601_v14  ;;  %v1775_v50 = vsel %vm1747_vm5, %v4943_v5, %v1095_v24  ;;  %v303_v14 = vld [vmem:[#allocation2 + $0x8] sm:$0xff] }
 0x237   : > { %2872 = vmatprep.mubr.msk.f32.mxu1 %vm1915_vm10, %v1904_v37  ;;  %v319_v37 = vld [vmem:[#allocation2 + $0x88] sm:$0xff] }
 0x239   : > { %v1221_v23 = vpop.permute.xlu1 %1220  ;;  %v1189_v7 = vpop.permute.xlu0 %1188 }
 0x23a   : > { %v1791_v17 = vsel %vm1780_vm6, %v1758_v40, %v1189_v7  ;;  %v1807_v31 = vsel %vm1780_vm6, %v1774_v62, %v1221_v23 }
 0x23d   : > { %v1603_v55 = vpop.permute.xlu1 %1602  ;;  %v1571_v10 = vpop.permute.xlu0 %1570 }
 0x23e   : > { %v1905_v2 = vsel %vm1879_vm9, %v1872_v25, %v1603_v55  ;;  %v1889_v60 = vsel %vm1879_vm9, %v1856_v39, %v1571_v10 }
 0x23f   : > { %2849 = vmatmul.mubr.msk.f32.gmra.mxu0 %vm1915_vm10, %v1889_v60  ;;  %2873 = vmatmul.mubr.msk.f32.gmra.mxu1 %vm1915_vm10, %v1905_v2 }
 0x241   : > { %v1223_v27 = vpop.permute.xlu1 %1222  ;;  %v1191_v18 = vpop.permute.xlu0 %1190 }
 0x242   : > { %v1808_v0 = vsel %vm1780_vm6, %v1775_v50, %v1223_v27  ;;  %v1792_v15 = vsel %vm1780_vm6, %v1759_v28, %v1191_v18  ;;  %v4944_v27 = vld [vmem:[#allocation18_spill] sm:$0xff]  ;;  %v4945_v18 = vld [vmem:[#allocation16_spill] sm:$0xff] }
 0x245   : > { %v1349_v52 = vpop.permute.xlu1 %1348  ;;  %v1317_v29 = vpop.permute.xlu0 %1316 }
 0x246   : > { %v1824_v57 = vsel %vm1813_vm7, %v1791_v17, %v1317_v29  ;;  %v1840_v38 = vsel %vm1813_vm7, %v1807_v31, %v1349_v52  ;;  %v1760_v52 = vsel %vm1747_vm5, %v4945_v18, %v4944_v27 }
 0x249   : > { %v1351_v20 = vpop.permute.xlu1 %1350  ;;  %v1319_v47 = vpop.permute.xlu0 %1318 }
 0x24a   : > { %v1841_v41 = vsel %vm1813_vm7, %v1808_v0, %v1351_v20  ;;  %v1825_v36 = vsel %vm1813_vm7, %v1792_v15, %v1319_v47 }
 0x24d   : > { %v1477_v22 = vpop.permute.xlu1 %1476  ;;  %v1445_v21 = vpop.permute.xlu0 %1444 }
 0x24e   : > { %v1857_v13 = vsel %vm1846_vm8, %v1824_v57, %v1445_v21  ;;  %v1873_v49 = vsel %vm1846_vm8, %v1840_v38, %v1477_v22  ;;  %v4947_v38 = vld [vmem:[#allocation6_spill] sm:$0xff] }
 0x251   : > { %v1447_v63 = vpop.permute.xlu1 %1446  ;;  %v4498_v8 = vpop.permute.xlu0 %1096 }
 0x252   : > { %v1858_v12 = vsel %vm1846_vm8, %v1825_v36, %v1447_v63  ;;  %v4946_v63 = vld [vmem:[#allocation41_spill] sm:$0xff] }
 0x253   : > { %v1776_v40 = vsel %vm1747_vm5, %v4946_v63, %v4498_v8  ;;  %v4948_v8 = vld [vmem:[#allocation38_spill] sm:$0xff] }
 0x255   : > { %v1573_v30 = vpop.permute.xlu1 %1572  ;;  %v1479_v48 = vpop.permute.xlu0 %1478 }
 0x256   : > { %v1890_v33 = vsel %vm1879_vm9, %v1857_v13, %v1573_v30  ;;  %v1874_v61 = vsel %vm1846_vm8, %v1841_v41, %v1479_v48 }
 0x257   : > { %2851 = vmatprep.mubr.msk.f32.mxu0 %vm1915_vm10, %v1890_v33 }
 0x259   : > { %v4513_v34 = vpop.permute.xlu1 %1098  ;;  %v1605_v6 = vpop.permute.xlu0 %1604 }
 0x25a   : > { %v1906_v9 = vsel %vm1879_vm9, %v1873_v49, %v1605_v6  ;;  %v1761_v49 = vsel %vm1747_vm5, %v4948_v8, %v4947_v38  ;;  %v4949_v6 = vld [vmem:[#allocation46_spill] sm:$0xff] }
 0x25b   : > { %2875 = vmatprep.mubr.msk.f32.mxu1 %vm1915_vm10, %v1906_v9  ;;  %v1777_v9 = vsel %vm1747_vm5, %v4949_v6, %v4513_v34  ;;  %v307_v6 = vld [vmem:[#allocation2 + $0x28] sm:$0xff] }
 0x25d   : > { %v1225_v16 = vpop.permute.xlu1 %1224  ;;  %v1193_v26 = vpop.permute.xlu0 %1192 }
 0x25e   : > { %v1793_v29 = vsel %vm1780_vm6, %v1760_v52, %v1193_v26  ;;  %v1809_v57 = vsel %vm1780_vm6, %v1776_v40, %v1225_v16  ;;  %v4955_v40 = vld [vmem:[#allocation42_spill] sm:$0xff] }
 0x261   : > { %v1607_v32 = vpop.permute.xlu1 %1606  ;;  %v1575_v54 = vpop.permute.xlu0 %1574 }
 0x262   : > { %v1907_v4 = vsel %vm1879_vm9, %v1874_v61, %v1607_v32  ;;  %v1891_v11 = vsel %vm1879_vm9, %v1858_v12, %v1575_v54 }
 0x263   : > { %2852 = vmatmul.mubr.msk.f32.gmra.mxu0 %vm1915_vm10, %v1891_v11  ;;  %2876 = vmatmul.mubr.msk.f32.gmra.mxu1 %vm1915_vm10, %v1907_v4  ;;  %v305_v4 = vld [vmem:[#allocation2 + $0x18] sm:$0xff] }
 0x264   : > { %v321_v11 = vld [vmem:[#allocation2 + $0x98] sm:$0xff] }
 0x265   : > { %v1227_v43 = vpop.permute.xlu1 %1226  ;;  %v1195_v35 = vpop.permute.xlu0 %1194 }
 0x266   : > { %v1810_v16 = vsel %vm1780_vm6, %v1777_v9, %v1227_v43  ;;  %v1794_v26 = vsel %vm1780_vm6, %v1761_v49, %v1195_v35  ;;  %v323_v9 = vld [vmem:[#allocation2 + $0xa8] sm:$0xff] }
 0x269   : > { %v1353_v56 = vpop.permute.xlu1 %1352  ;;  %v1321_v3 = vpop.permute.xlu0 %1320 }
 0x26a   : > { %v1826_v20 = vsel %vm1813_vm7, %v1793_v29, %v1321_v3  ;;  %v1842_v13 = vsel %vm1813_vm7, %v1809_v57, %v1353_v56  ;;  %v304_v56 = vld [vmem:[#allocation2 + $0x10] sm:$0xff] }
 0x26b   : > { %v320_v3 = vld [vmem:[#allocation2 + $0x90] sm:$0xff] }
 0x26d   : > { %v1355_v44 = vpop.permute.xlu1 %1354  ;;  %v1323_v24 = vpop.permute.xlu0 %1322 }
 0x26e   : > { %v1843_v58 = vsel %vm1813_vm7, %v1810_v16, %v1355_v44  ;;  %v1827_v19 = vsel %vm1813_vm7, %v1794_v26, %v1323_v24 }
 0x270   : > { %v2838_v23 = vpop.f32.mrf.mxu0  ;;  %v2862_v7 = vpop.f32.mrf.mxu1 }
 0x271   : > { %v2242_v42 = vadd.f32 %v2838_v23, %v303_v14  ;;  %v2258_v45 = vadd.f32 %v2862_v7, %v319_v37  ;;  %v1481_v59 = vpop.permute.xlu1 %1480  ;;  %v1449_v46 = vpop.permute.xlu0 %1448 }
 0x272   : > { %v2082_v39 = vpop.f32.mrf.mxu0  ;;  %v2162_v25 = vpop.f32.mrf.mxu1  ;;  %v1859_v47 = vsel %vm1846_vm8, %v1826_v20, %v1449_v46  ;;  %v1875_v30 = vsel %vm1846_vm8, %v1842_v13, %v1481_v59  ;;  %v4950_v59 = vld [vmem:[#allocation11_spill] sm:$0xff] }
 0x273   : > { %2275 = vst.msk [vmem:[#allocation2 + $0x8] sm:$0xff] %vm2273_vm11, %v2242_v42  ;;  %2291 = vst.msk [vmem:[#allocation2 + $0x88] sm:$0xff] %vm2273_vm11, %v2258_v45  ;;  %v2241_v55 = vadd.f32 %v2082_v39, %v302_v1  ;;  %v2257_v10 = vadd.f32 %v2162_v25, %v318_v53  ;;  %v4951_v46 = vld [vmem:[#allocation39_spill] sm:$0xff] }
 0x274   : > { %v1762_v39 = vsel %vm1747_vm5, %v4951_v46, %v4950_v59  ;;  %v4952_v25 = vld [vmem:[#allocation7_spill] sm:$0xff] }
 0x275   : > { %2274 = vst.msk [vmem:[#allocation2] sm:$0xff] %vm2273_vm11, %v2241_v55  ;;  %2290 = vst.msk [vmem:[#allocation2 + $0x80] sm:$0xff] %vm2273_vm11, %v2257_v10  ;;  %v1451_v2 = vpop.permute.xlu1 %1450  ;;  %v1101_v60 = vpop.permute.xlu0 %1100 }
 0x276   : > { %v1860_v28 = vsel %vm1846_vm8, %v1827_v19, %v1451_v2  ;;  %v1778_v55 = vsel %vm1747_vm5, %v4952_v25, %v1101_v60  ;;  %v322_v19 = vld [vmem:[#allocation2 + $0xa0] sm:$0xff]  ;;  %v329_v25 = vld [vmem:[#allocation2 + $0xd8] sm:$0xff] }
 0x279   : > { %v1577_v22 = vpop.permute.xlu1 %1576  ;;  %v1483_v21 = vpop.permute.xlu0 %1482 }
 0x27a   : > { %v1892_v17 = vsel %vm1879_vm9, %v1859_v47, %v1577_v22  ;;  %v1876_v5 = vsel %vm1846_vm8, %v1843_v58, %v1483_v21  ;;  %v4953_v22 = vld [vmem:[#allocation17_spill] sm:$0xff]  ;;  %v4954_v21 = vld [vmem:[#allocation10_spill] sm:$0xff] }
 0x27b   : > { %2854 = vmatprep.mubr.msk.f32.mxu0 %vm1915_vm10, %v1892_v17  ;;  %v1763_v63 = vsel %vm1747_vm5, %v4954_v21, %v4953_v22  ;;  %v306_v58 = vld [vmem:[#allocation2 + $0x20] sm:$0xff]  ;;  %v315_v21 = vld [vmem:[#allocation2 + $0x68] sm:$0xff] }
 0x27d   : > { %v1103_v48 = vpop.permute.xlu1 %1102  ;;  %v1609_v51 = vpop.permute.xlu0 %1608 }
 0x27e   : > { %v1908_v62 = vsel %vm1879_vm9, %v1875_v30, %v1609_v51  ;;  %v1779_v60 = vsel %vm1747_vm5, %v4955_v40, %v1103_v48 }
 0x27f   : > { %2878 = vmatprep.mubr.msk.f32.mxu1 %vm1915_vm10, %v1908_v62 }
 0x281   : > { %v1229_v33 = vpop.permute.xlu1 %1228  ;;  %v1197_v31 = vpop.permute.xlu0 %1196 }
 0x282   : > { %v1811_v10 = vsel %vm1780_vm6, %v1778_v55, %v1229_v33  ;;  %v1795_v2 = vsel %vm1780_vm6, %v1762_v39, %v1197_v31  ;;  %v313_v39 = vld [vmem:[#allocation2 + $0x58] sm:$0xff] }
 0x285   : > { %v1611_v50 = vpop.permute.xlu1 %1610  ;;  %v1579_v0 = vpop.permute.xlu0 %1578 }
 0x286   : > { %v1909_v15 = vsel %vm1879_vm9, %v1876_v5, %v1611_v50  ;;  %v1893_v41 = vsel %vm1879_vm9, %v1860_v28, %v1579_v0 }
 0x287   : > { %2855 = vmatmul.mubr.msk.f32.gmra.mxu0 %vm1915_vm10, %v1893_v41  ;;  %2879 = vmatmul.mubr.msk.f32.gmra.mxu1 %vm1915_vm10, %v1909_v15 }
 0x289   : > { %v1231_v34 = vpop.permute.xlu1 %1230  ;;  %v1199_v36 = vpop.permute.xlu0 %1198 }
 0x28a   : > { %v1812_v13 = vsel %vm1780_vm6, %v1779_v60, %v1231_v34  ;;  %v1796_v30 = vsel %vm1780_vm6, %v1763_v63, %v1199_v36  ;;  %v309_v34 = vld [vmem:[#allocation2 + $0x38] sm:$0xff]  ;;  %v331_v63 = vld [vmem:[#allocation2 + $0xe8] sm:$0xff] }
 0x28b   : > { %v325_v36 = vld [vmem:[#allocation2 + $0xb8] sm:$0xff] }
 0x28d   : > { %v1357_v12 = vpop.permute.xlu1 %1356  ;;  %v1325_v61 = vpop.permute.xlu0 %1324 }
 0x28e   : > { %v1844_v27 = vsel %vm1813_vm7, %v1811_v10, %v1357_v12  ;;  %v1828_v18 = vsel %vm1813_vm7, %v1795_v2, %v1325_v61  ;;  %v312_v2 = vld [vmem:[#allocation2 + $0x50] sm:$0xff] }
 0x291   : > { %v1359_v32 = vpop.permute.xlu1 %1358  ;;  %v1327_v54 = vpop.permute.xlu0 %1326 }
 0x292   : > { %v1845_v51 = vsel %vm1813_vm7, %v1812_v13, %v1359_v32  ;;  %v1829_v62 = vsel %vm1813_vm7, %v1796_v30, %v1327_v54  ;;  %v308_v32 = vld [vmem:[#allocation2 + $0x30] sm:$0xff] }
 0x293   : > { %v324_v54 = vld [vmem:[#allocation2 + $0xb0] sm:$0xff] }
 0x294   : > { %v2841_v43 = vpop.f32.mrf.mxu0  ;;  %v2865_v35 = vpop.f32.mrf.mxu1 }
 0x295   : > { %v2244_v44 = vadd.f32 %v2841_v43, %v305_v4  ;;  %v2260_v24 = vadd.f32 %v2865_v35, %v321_v11  ;;  %v1485_v14 = vpop.permute.xlu1 %1484  ;;  %v1453_v37 = vpop.permute.xlu0 %1452 }
 0x296   : > { %v2092_v23 = vpop.f32.mrf.mxu0  ;;  %v2172_v7 = vpop.f32.mrf.mxu1  ;;  %v1877_v52 = vsel %vm1846_vm8, %v1844_v27, %v1485_v14  ;;  %v1861_v29 = vsel %vm1846_vm8, %v1828_v18, %v1453_v37  ;;  %v328_v27 = vld [vmem:[#allocation2 + $0xd0] sm:$0xff] }
 0x297   : > { %2277 = vst.msk [vmem:[#allocation2 + $0x18] sm:$0xff] %vm2273_vm11, %v2244_v44  ;;  %2293 = vst.msk [vmem:[#allocation2 + $0x98] sm:$0xff] %vm2273_vm11, %v2260_v24  ;;  %v2243_v1 = vadd.f32 %v2092_v23, %v304_v56  ;;  %v2259_v53 = vadd.f32 %v2172_v7, %v320_v3  ;;  %v311_v44 = vld [vmem:[#allocation2 + $0x48] sm:$0xff]  ;;  %v310_v23 = vld [vmem:[#allocation2 + $0x40] sm:$0xff] }
 0x298   : > { %v327_v24 = vld [vmem:[#allocation2 + $0xc8] sm:$0xff]  ;;  %v326_v7 = vld [vmem:[#allocation2 + $0xc0] sm:$0xff] }
 0x299   : > { %2276 = vst.msk [vmem:[#allocation2 + $0x10] sm:$0xff] %vm2273_vm11, %v2243_v1  ;;  %2292 = vst.msk [vmem:[#allocation2 + $0x90] sm:$0xff] %vm2273_vm11, %v2259_v53  ;;  %v1487_v42 = vpop.permute.xlu1 %1486  ;;  %v1455_v45 = vpop.permute.xlu0 %1454 }
 0x29a   : > { %v1878_v33 = vsel %vm1846_vm8, %v1845_v51, %v1487_v42  ;;  %v1862_v48 = vsel %vm1846_vm8, %v1829_v62, %v1455_v45 }
 0x29d   : > { %v1613_v20 = vpop.permute.xlu1 %1612  ;;  %v1581_v47 = vpop.permute.xlu0 %1580 }
 0x29e   : > { %v1910_v17 = vsel %vm1879_vm9, %v1877_v52, %v1613_v20  ;;  %v1894_v57 = vsel %vm1879_vm9, %v1861_v29, %v1581_v47 }
 0x29f   : > { %2857 = vmatprep.mubr.msk.f32.mxu0 %vm1915_vm10, %v1894_v57  ;;  %2881 = vmatprep.mubr.msk.f32.mxu1 %vm1915_vm10, %v1910_v17  ;;  %v314_v17 = vld [vmem:[#allocation2 + $0x60] sm:$0xff] }
 0x2a0   : > { %v330_v57 = vld [vmem:[#allocation2 + $0xe0] sm:$0xff] }
 0x2a1   : > { %v1615_v31 = vpop.permute.xlu1 %1614  ;;  %v1583_v38 = vpop.permute.xlu0 %1582 }
 0x2a2   : > { %v1911_v8 = vsel %vm1879_vm9, %v1878_v33, %v1615_v31  ;;  %v1895_v49 = vsel %vm1879_vm9, %v1862_v48, %v1583_v38  ;;  %v317_v31 = vld [vmem:[#allocation2 + $0x78] sm:$0xff] }
 0x2a3   : > { %2858 = vmatmul.mubr.msk.f32.gmra.mxu0 %vm1915_vm10, %v1895_v49  ;;  %2882 = vmatmul.mubr.msk.f32.gmra.mxu1 %vm1915_vm10, %v1911_v8  ;;  %v333_v38 = vld [vmem:[#allocation2 + $0xf8] sm:$0xff] }
 0x2b8   : > { %v2844_v16 = vpop.f32.mrf.mxu0  ;;  %v2868_v26 = vpop.f32.mrf.mxu1 }
 0x2b9   : > { %v2246_v28 = vadd.f32 %v2844_v16, %v307_v6  ;;  %v2262_v5 = vadd.f32 %v2868_v26, %v323_v9  ;;  %v316_v6 = vld [vmem:[#allocation2 + $0x70] sm:$0xff] }
 0x2ba   : > { %v2102_v50 = vpop.f32.mrf.mxu0  ;;  %v2182_v0 = vpop.f32.mrf.mxu1  ;;  %v332_v9 = vld [vmem:[#allocation2 + $0xf0] sm:$0xff] }
 0x2bb   : > { %2279 = vst.msk [vmem:[#allocation2 + $0x28] sm:$0xff] %vm2273_vm11, %v2246_v28  ;;  %2295 = vst.msk [vmem:[#allocation2 + $0xa8] sm:$0xff] %vm2273_vm11, %v2262_v5  ;;  %v2245_v15 = vadd.f32 %v2102_v50, %v306_v58  ;;  %v2261_v41 = vadd.f32 %v2182_v0, %v322_v19 }
 0x2bd   : > { %2278 = vst.msk [vmem:[#allocation2 + $0x20] sm:$0xff] %vm2273_vm11, %v2245_v15  ;;  %2294 = vst.msk [vmem:[#allocation2 + $0xa0] sm:$0xff] %vm2273_vm11, %v2261_v41 }
 0x2dc   : > { %v2847_v12 = vpop.f32.mrf.mxu0  ;;  %v2871_v61 = vpop.f32.mrf.mxu1 }
 0x2dd   : > { %v2248_v4 = vadd.f32 %v2847_v12, %v309_v34  ;;  %v2264_v11 = vadd.f32 %v2871_v61, %v325_v36 }
 0x2de   : > { %v2112_v43 = vpop.f32.mrf.mxu0  ;;  %v2192_v35 = vpop.f32.mrf.mxu1 }
 0x2df   : > { %2281 = vst.msk [vmem:[#allocation2 + $0x38] sm:$0xff] %vm2273_vm11, %v2248_v4  ;;  %2297 = vst.msk [vmem:[#allocation2 + $0xb8] sm:$0xff] %vm2273_vm11, %v2264_v11  ;;  %v2247_v56 = vadd.f32 %v2112_v43, %v308_v32  ;;  %v2263_v3 = vadd.f32 %v2192_v35, %v324_v54 }
 0x2e1   : > { %2280 = vst.msk [vmem:[#allocation2 + $0x30] sm:$0xff] %vm2273_vm11, %v2247_v56  ;;  %2296 = vst.msk [vmem:[#allocation2 + $0xb0] sm:$0xff] %vm2273_vm11, %v2263_v3 }
 0x2ff   : > { %v2850_v14 = vpop.f32.mrf.mxu0  ;;  %v2874_v37 = vpop.f32.mrf.mxu1 }
 0x300   : > { %v2250_v1 = vadd.f32 %v2850_v14, %v311_v44  ;;  %v2266_v53 = vadd.f32 %v2874_v37, %v327_v24 }
 0x301   : > { %v2122_v42 = vpop.f32.mrf.mxu0  ;;  %v2202_v45 = vpop.f32.mrf.mxu1 }
 0x302   : > { %2283 = vst.msk [vmem:[#allocation2 + $0x48] sm:$0xff] %vm2273_vm11, %v2250_v1  ;;  %2299 = vst.msk [vmem:[#allocation2 + $0xc8] sm:$0xff] %vm2273_vm11, %v2266_v53  ;;  %v2249_v59 = vadd.f32 %v2122_v42, %v310_v23  ;;  %v2265_v46 = vadd.f32 %v2202_v45, %v326_v7 }
 0x304   : > { %2282 = vst.msk [vmem:[#allocation2 + $0x40] sm:$0xff] %vm2273_vm11, %v2249_v59  ;;  %2298 = vst.msk [vmem:[#allocation2 + $0xc0] sm:$0xff] %vm2273_vm11, %v2265_v46 }
 0x323   : > { %v2853_v55 = vpop.f32.mrf.mxu0  ;;  %v2877_v10 = vpop.f32.mrf.mxu1 }
 0x324   : > { %v2252_v18 = vadd.f32 %v2853_v55, %v313_v39  ;;  %v2268_v52 = vadd.f32 %v2877_v10, %v329_v25 }
 0x325   : > { %v2132_v29 = vpop.f32.mrf.mxu0  ;;  %v2212_v20 = vpop.f32.mrf.mxu1 }
 0x326   : > { %2285 = vst.msk [vmem:[#allocation2 + $0x58] sm:$0xff] %vm2273_vm11, %v2252_v18  ;;  %2301 = vst.msk [vmem:[#allocation2 + $0xd8] sm:$0xff] %vm2273_vm11, %v2268_v52  ;;  %v2251_v47 = vadd.f32 %v2132_v29, %v312_v2  ;;  %v2267_v22 = vadd.f32 %v2212_v20, %v328_v27 }
 0x328   : > { %2284 = vst.msk [vmem:[#allocation2 + $0x50] sm:$0xff] %vm2273_vm11, %v2251_v47  ;;  %2300 = vst.msk [vmem:[#allocation2 + $0xd0] sm:$0xff] %vm2273_vm11, %v2267_v22 }
 0x347   : > { %v2856_v40 = vpop.f32.mrf.mxu0  ;;  %v2880_v60 = vpop.f32.mrf.mxu1 }
 0x348   : > { %v2254_v13 = vadd.f32 %v2856_v40, %v315_v21  ;;  %v2270_v30 = vadd.f32 %v2880_v60, %v331_v63 }
 0x349   : > { %v2142_v51 = vpop.f32.mrf.mxu0  ;;  %v2222_v62 = vpop.f32.mrf.mxu1 }
 0x34a   : > { %2287 = vst.msk [vmem:[#allocation2 + $0x68] sm:$0xff] %vm2273_vm11, %v2254_v13  ;;  %2303 = vst.msk [vmem:[#allocation2 + $0xe8] sm:$0xff] %vm2273_vm11, %v2270_v30  ;;  %v2253_v33 = vadd.f32 %v2142_v51, %v314_v17  ;;  %v2269_v48 = vadd.f32 %v2222_v62, %v330_v57 }
 0x34c   : > { %2286 = vst.msk [vmem:[#allocation2 + $0x60] sm:$0xff] %vm2273_vm11, %v2253_v33  ;;  %2302 = vst.msk [vmem:[#allocation2 + $0xe0] sm:$0xff] %vm2273_vm11, %v2269_v48 }
 0x363   : > { %v2859_v8 = vpop.f32.mrf.mxu0  ;;  %v2883_v49 = vpop.f32.mrf.mxu1 }
 0x364   : > { %v2256_v16 = vadd.f32 %v2859_v8, %v317_v31  ;;  %v2272_v26 = vadd.f32 %v2883_v49, %v333_v38  ;;  %2309 = sbr.rel (%p2787_p1) target bundleno = 893 (0x37d), region = 40 }
 0x365   : > { %v2152_v58 = vpop.f32.mrf.mxu0  ;;  %v2232_v19 = vpop.f32.mrf.mxu1 }
 0x366   : > { %2289 = vst.msk [vmem:[#allocation2 + $0x78] sm:$0xff] %vm2273_vm11, %v2256_v16  ;;  %2305 = vst.msk [vmem:[#allocation2 + $0xf8] sm:$0xff] %vm2273_vm11, %v2272_v26  ;;  %v2255_v28 = vadd.f32 %v2152_v58, %v316_v6  ;;  %v2271_v5 = vadd.f32 %v2232_v19, %v332_v9 }
 0x368   : > { %2288 = vst.msk [vmem:[#allocation2 + $0x70] sm:$0xff] %vm2273_vm11, %v2255_v28  ;;  %2304 = vst.msk [vmem:[#allocation2 + $0xf0] sm:$0xff] %vm2273_vm11, %v2271_v5 }
 0x369   : > { %v2310_v50 = vld [vmem:[#allocation2] sm:$0xff]  ;;  %v2311_v15 = vld [vmem:[#allocation2 + $0x8] sm:$0xff]  ;;  %v2312_v36 = vld [vmem:[#allocation2 + $0x10] sm:$0xff] }
 0x36a   : > { %v4630_v0 = vld [vmem:[%s4793_s2] ss:$0 sm:$0xff]  ;;  %v2313_v12 = vld [vmem:[#allocation2 + $0x18] sm:$0xff]  ;;  %v2315_v11 = vld [vmem:[#allocation2 + $0x28] sm:$0xff] }
 0x36b   : > { %v2349_v41 = vadd.f32 %v4630_v0, %v2310_v50  ;;  %v2350_v34 = vadd.f32 %v4630_v0, %v2311_v15  ;;  %v2314_v61 = vld [vmem:[#allocation2 + $0x20] sm:$0xff]  ;;  %v2351_v32 = vadd.f32 %v4630_v0, %v2312_v36  ;;  %v2352_v54 = vadd.f32 %v4630_v0, %v2313_v12  ;;  %v2316_v43 = vld [vmem:[#allocation2 + $0x30] sm:$0xff]  ;;  %v2317_v35 = vld [vmem:[#allocation2 + $0x38] sm:$0xff] }
 0x36c   : > { %v2353_v4 = vadd.f32 %v4630_v0, %v2314_v61  ;;  %v2354_v56 = vadd.f32 %v4630_v0, %v2315_v11  ;;  %v2355_v3 = vadd.f32 %v4630_v0, %v2316_v43  ;;  %v2356_v44 = vadd.f32 %v4630_v0, %v2317_v35  ;;  %v2318_v24 = vld [vmem:[#allocation2 + $0x40] sm:$0xff]  ;;  %v2319_v14 = vld [vmem:[#allocation2 + $0x48] sm:$0xff]  ;;  %v2320_v37 = vld [vmem:[#allocation2 + $0x50] sm:$0xff] }
 0x36d   : > { %2381 = vst.msk [vmem:[%s3184_s26] sm:$0xff] %vm2273_vm11, %v2349_v41  ;;  %2382 = vst.msk [vmem:[%s3184_s26 + $0x8] sm:$0xff] %vm2273_vm11, %v2350_v34  ;;  %v2357_v23 = vadd.f32 %v4630_v0, %v2318_v24  ;;  %v2358_v7 = vadd.f32 %v4630_v0, %v2319_v14  ;;  %v2359_v1 = vadd.f32 %v4630_v0, %v2320_v37  ;;  %v2321_v53 = vld [vmem:[#allocation2 + $0x58] sm:$0xff]  ;;  %v2322_v42 = vld [vmem:[#allocation2 + $0x60] sm:$0xff] }
 0x36e   : > { %2383 = vst.msk [vmem:[%s3184_s26 + $0x10] sm:$0xff] %vm2273_vm11, %v2351_v32  ;;  %2384 = vst.msk [vmem:[%s3184_s26 + $0x18] sm:$0xff] %vm2273_vm11, %v2352_v54  ;;  %v2323_v45 = vld [vmem:[#allocation2 + $0x68] sm:$0xff]  ;;  %v2360_v59 = vadd.f32 %v4630_v0, %v2321_v53  ;;  %v2361_v46 = vadd.f32 %v4630_v0, %v2322_v42  ;;  %v2325_v55 = vld [vmem:[#allocation2 + $0x78] sm:$0xff] }
 0x36f   : > { %2385 = vst.msk [vmem:[%s3184_s26 + $0x20] sm:$0xff] %vm2273_vm11, %v2353_v4  ;;  %2386 = vst.msk [vmem:[%s3184_s26 + $0x28] sm:$0xff] %vm2273_vm11, %v2354_v56  ;;  %v2362_v39 = vadd.f32 %v4630_v0, %v2323_v45  ;;  %v2324_v25 = vld [vmem:[#allocation2 + $0x70] sm:$0xff]  ;;  %v2326_v10 = vld [vmem:[#allocation2 + $0x80] sm:$0xff]  ;;  %v2364_v27 = vadd.f32 %v4630_v0, %v2325_v55 }
 0x370   : > { %2387 = vst.msk [vmem:[%s3184_s26 + $0x30] sm:$0xff] %vm2273_vm11, %v2355_v3  ;;  %2388 = vst.msk [vmem:[%s3184_s26 + $0x38] sm:$0xff] %vm2273_vm11, %v2356_v44  ;;  %v2363_v2 = vadd.f32 %v4630_v0, %v2324_v25  ;;  %v2365_v18 = vadd.f32 %v4630_v0, %v2326_v10  ;;  %v2327_v52 = vld [vmem:[#allocation2 + $0x88] sm:$0xff]  ;;  %v2328_v29 = vld [vmem:[#allocation2 + $0x90] sm:$0xff] }
 0x371   : > { %2389 = vst.msk [vmem:[%s3184_s26 + $0x40] sm:$0xff] %vm2273_vm11, %v2357_v23  ;;  %2390 = vst.msk [vmem:[%s3184_s26 + $0x48] sm:$0xff] %vm2273_vm11, %v2358_v7  ;;  %v2329_v20 = vld [vmem:[#allocation2 + $0x98] sm:$0xff]  ;;  %v2366_v47 = vadd.f32 %v4630_v0, %v2327_v52  ;;  %v2367_v22 = vadd.f32 %v4630_v0, %v2328_v29  ;;  %v2330_v63 = vld [vmem:[#allocation2 + $0xa0] sm:$0xff] }
 0x372   : > { %2391 = vst.msk [vmem:[%s3184_s26 + $0x50] sm:$0xff] %vm2273_vm11, %v2359_v1  ;;  %2392 = vst.msk [vmem:[%s3184_s26 + $0x58] sm:$0xff] %vm2273_vm11, %v2360_v59  ;;  %v2368_v21 = vadd.f32 %v4630_v0, %v2329_v20  ;;  %v2331_v40 = vld [vmem:[#allocation2 + $0xa8] sm:$0xff]  ;;  %v2332_v60 = vld [vmem:[#allocation2 + $0xb0] sm:$0xff]  ;;  %v2369_v17 = vadd.f32 %v4630_v0, %v2330_v63 }
 0x373   : > { %2393 = vst.msk [vmem:[%s3184_s26 + $0x60] sm:$0xff] %vm2273_vm11, %v2361_v46  ;;  %2394 = vst.msk [vmem:[%s3184_s26 + $0x68] sm:$0xff] %vm2273_vm11, %v2362_v39  ;;  %v2370_v57 = vadd.f32 %v4630_v0, %v2331_v40  ;;  %v2371_v13 = vadd.f32 %v4630_v0, %v2332_v60  ;;  %v2333_v30 = vld [vmem:[#allocation2 + $0xb8] sm:$0xff]  ;;  %v2334_v51 = vld [vmem:[#allocation2 + $0xc0] sm:$0xff] }
 0x374   : > { %2395 = vst.msk [vmem:[%s3184_s26 + $0x70] sm:$0xff] %vm2273_vm11, %v2363_v2  ;;  %2396 = vst.msk [vmem:[%s3184_s26 + $0x78] sm:$0xff] %vm2273_vm11, %v2364_v27  ;;  %v2335_v62 = vld [vmem:[#allocation2 + $0xc8] sm:$0xff]  ;;  %v2372_v33 = vadd.f32 %v4630_v0, %v2333_v30  ;;  %v2373_v48 = vadd.f32 %v4630_v0, %v2334_v51  ;;  %v2336_v38 = vld [vmem:[#allocation2 + $0xd0] sm:$0xff] }
 0x375   : > { %2397 = vst.msk [vmem:[%s3184_s26 + $0x80] sm:$0xff] %vm2273_vm11, %v2365_v18  ;;  %2398 = vst.msk [vmem:[%s3184_s26 + $0x88] sm:$0xff] %vm2273_vm11, %v2366_v47  ;;  %v2374_v31 = vadd.f32 %v4630_v0, %v2335_v62  ;;  %v2337_v8 = vld [vmem:[#allocation2 + $0xd8] sm:$0xff]  ;;  %v2338_v49 = vld [vmem:[#allocation2 + $0xe0] sm:$0xff]  ;;  %v2375_v6 = vadd.f32 %v4630_v0, %v2336_v38 }
 0x376   : > { %2399 = vst.msk [vmem:[%s3184_s26 + $0x90] sm:$0xff] %vm2273_vm11, %v2367_v22  ;;  %2400 = vst.msk [vmem:[%s3184_s26 + $0x98] sm:$0xff] %vm2273_vm11, %v2368_v21  ;;  %v2376_v9 = vadd.f32 %v4630_v0, %v2337_v8  ;;  %v2377_v16 = vadd.f32 %v4630_v0, %v2338_v49  ;;  %v2339_v26 = vld [vmem:[#allocation2 + $0xe8] sm:$0xff]  ;;  %v2340_v58 = vld [vmem:[#allocation2 + $0xf0] sm:$0xff] }
 0x377   : > { %2401 = vst.msk [vmem:[%s3184_s26 + $0xa0] sm:$0xff] %vm2273_vm11, %v2369_v17  ;;  %2402 = vst.msk [vmem:[%s3184_s26 + $0xa8] sm:$0xff] %vm2273_vm11, %v2370_v57  ;;  %v2341_v19 = vld [vmem:[#allocation2 + $0xf8] sm:$0xff]  ;;  %v2378_v28 = vadd.f32 %v4630_v0, %v2339_v26  ;;  %v2379_v5 = vadd.f32 %v4630_v0, %v2340_v58 }
 0x378   : > { %2403 = vst.msk [vmem:[%s3184_s26 + $0xb0] sm:$0xff] %vm2273_vm11, %v2371_v13  ;;  %2404 = vst.msk [vmem:[%s3184_s26 + $0xb8] sm:$0xff] %vm2273_vm11, %v2372_v33  ;;  %v2380_v50 = vadd.f32 %v4630_v0, %v2341_v19 }
 0x379   : > { %2405 = vst.msk [vmem:[%s3184_s26 + $0xc0] sm:$0xff] %vm2273_vm11, %v2373_v48  ;;  %2406 = vst.msk [vmem:[%s3184_s26 + $0xc8] sm:$0xff] %vm2273_vm11, %v2374_v31 }
 0x37a   : > { %2407 = vst.msk [vmem:[%s3184_s26 + $0xd0] sm:$0xff] %vm2273_vm11, %v2375_v6  ;;  %2408 = vst.msk [vmem:[%s3184_s26 + $0xd8] sm:$0xff] %vm2273_vm11, %v2376_v9 }
 0x37b   : > { %2409 = vst.msk [vmem:[%s3184_s26 + $0xe0] sm:$0xff] %vm2273_vm11, %v2377_v16  ;;  %2410 = vst.msk [vmem:[%s3184_s26 + $0xe8] sm:$0xff] %vm2273_vm11, %v2378_v28 }
 0x37c   : > { %2411 = vst.msk [vmem:[%s3184_s26 + $0xf0] sm:$0xff] %vm2273_vm11, %v2379_v5  ;;  %2412 = vst.msk [vmem:[%s3184_s26 + $0xf8] sm:$0xff] %vm2273_vm11, %v2380_v50 }
 0x37d PF: > { %s2794_s15 = sshll.u32 %s3053_s16, 12  ;;  %s2430_s30 = sshll.u32 %s3184_s26, 4  ;;  %s4735_s30 = int_to_ptr.vmem [resolvable:$true] %s2430_s30 }
 0x37e   : > { %s4732_s27 = scalar_lea.hbm %s4794_s3, %s2794_s15  ;;  %s4739_s4 = scalar_lea.sflag [#allocation4], %s240_s29 }
 0x37f   : > { %s2973_s6 = scalar_lea.vmem %s4735_s30, 4096  ;;  %s3076_s16 = smov [#allocation3]  }
 0x380   : > { %p2974_p2 = scmp.ne.s32.totalorder %s4735_s30, %s2973_s6  ;;  %s2977_s7 = sshll.u32 %s3076_s16, 4  ;;  %s2978_s7 = int_to_ptr.vmem [resolvable:$false] %s2977_s7 }
 0x381   : > { %s2979_s8 = scalar_lea.vmem %s2978_s7, 8192  ;;  %p2980_p6 = scmp.lt.s32.totalorder %s4735_s30, %s2978_s7 }
 0x382   : > { %p2975_p4 = pnand %p2974_p2, %p3147_p3  ;;  %p2981_p7 = scmp.lt.s32.totalorder %s2979_s8, %s2973_s6 }
 0x384   : > { %p2976_p5 = pneg %p2975_p4  ;;  %p2982_p8 = por %p2981_p7, %p2980_p6 }
 0x386   : > { %p2983_p10 = pnand %p2982_p8, %p2976_p5 }
 0x388   : > { %2986 = shalt.err (!%p2983_p10)
}
 0x389   : > { %s2987_s29 = scalar_lea.hbm %s4732_s27, 4096  ;;  %s2991_s10 = scalar_lea.hbm %s4794_s3, 8192 }
 0x38a   : > { %p2988_p11 = scmp.ne.s32.totalorder %s4732_s27, %s2987_s29  ;;  %p2992_p0 = scmp.lt.s32.totalorder %s4732_s27, %s4794_s3 }
 0x38b   : > { %p2993_p1 = scmp.lt.s32.totalorder %s2991_s10, %s2987_s29 }
 0x38c   : > { %p2989_p12 = pnand %p2988_p11, %p3147_p3 }
 0x38d   : > { %p2994_p2 = por %p2993_p1, %p2992_p0 }
 0x38e   : > { %p2990_p13 = pneg %p2989_p12 }
 0x390   : > { %p2995_p4 = pnand %p2994_p2, %p2990_p13 }
 0x392   : > { %2998 = shalt.err (!%p2995_p4)
}
 0x393   : > { %s3077_s20 = smov 128  }
 0x394   : > { %2892 = dma.vmem_to_hbm [thread:$0]  (%p3147_p3), %s4735_s30, 4096, %s4732_s27, %s4739_s4, %s3077_s20, %s3077_s20, %s3071_s5  }
 0x395 PF: > { %p2898_p5 = scmp.ge.s32.totalorder %s3065_s19, 2  ;;  %s2445_s21 = sand.u32 1, %s3037_s12  }
 0x396   : > { %s2446_s6 = scalar_lea.sflag [#allocation4], %s2445_s21 }
 0x397   : > { %p2895_p6 = pnand %p2898_p5, %p3157_p9 }
 0x399   : > { %p2896_p7 = pneg %p2895_p6 }
 0x39b   : > { %3032 = dma.done.wait (%p2896_p7), %s2446_s6, 4096  }
 0x39c   : > { %3034 = vsyncadd (%p2896_p7), %s2446_s6, 4294963200  ;;  %s16_s19 = sadd.s32 1, %s3065_s19   ;;  %s4956_s12 = smov %s3041_s13 }
 0x39d   : > { %p13_p8 = scmp.ge.s32.totalorder %s16_s19, 8   ;;  %s4957_s13 = smov %s3045_s14 }
 0x39e   : > { %s4958_s14 = smov %s3165_s28  ;;  %s4959_s15 = smov %s3057_s17 }
 0x39f   : > { %s4960_s16 = smov %s3061_s18  ;;  %s4961_s17 = smov %s4964_s22 }
 0x3a0   : > { %s4962_s18 = smov %s4968_s23  ;;  %15 = sbr.rel (!%p13_p8) target bundleno = 5 (0x5), region = 83 }
 0x3a5   :  { %2451 = vsyncpa [#allocation4], 1 }
 0x3a6   :  { %2453 = vsyncpa [#allocation4 + $0x1], 1 }

</bundles_post_ra>
